<compile_context>
chip_gen: v7x
topology: tpu7x:2x2x1
jax: 0.10.0
libtpu: 0.0.40
codegen_flags: <defaults>
</compile_context>

<pallas_src>
import math

import jax
import jax.numpy as jnp
from jax import lax
from jax.experimental import pallas as pl
from jax.experimental.pallas import tpu as pltpu

# Small, forward-consistent hyperparameters (scaled down from 768/8/8/2048).
D_MODEL = 32
N_HEAD = 4
HEAD_DIM = D_MODEL // N_HEAD
NUM_LAYERS = 2
DIM_FF = 64
VOCAB = 19
VOCAB_PAD = 32          # vocab padded to a clean sublane multiple for the MXU
LN_EPS = 1e-5
MAXLEN = 64
NEG_INF = -1e9          # pad-mask fill (documented divergence from -inf/NaN)


# ---------------------------------------------------------------------------
# Fused forward kernel (one batch tile of B elements per grid step)
# ---------------------------------------------------------------------------
def _layernorm(y, g, b):
    mean = jnp.mean(y, axis=-1, keepdims=True)
    var = jnp.mean((y - mean) ** 2, axis=-1, keepdims=True)
    return (y - mean) * lax.rsqrt(var + LN_EPS) * g + b


def _dot_bf16(a, b):
    """MXU matmul: bf16 operands, f32 accumulation."""
    return jnp.dot(a.astype(jnp.bfloat16), b.astype(jnp.bfloat16),
                   preferred_element_type=jnp.float32)


def _encoder_fwd_kernel(tokens_ref, emb_tbl_ref, pos_ref, src_mask_ref, pad_ref,
                        w_qkv_ref, b_qkv_ref, w_out_ref, b_out_ref,
                        w_ff1_ref, b_ff1_ref, w_ff2_ref, b_ff2_ref,
                        ln1_g_ref, ln1_b_ref, ln2_g_ref, ln2_b_ref,
                        o_ref):
    B = pad_ref.shape[1]            # batch elements in this tile
    S = src_mask_ref.shape[0]       # sequence length
    M = B * S                       # flattened rows for all matmuls
    E = D_MODEL
    H = N_HEAD

    # --- token embedding as a one-hot matmul over the padded (32-row) vocab ---
    tok = tokens_ref[0]                                          # (M, 1) int32
    onehot = (tok == lax.broadcasted_iota(jnp.int32, (M, VOCAB_PAD), 1))
    emb = jnp.dot(onehot.astype(jnp.bfloat16), emb_tbl_ref[...],
                  preferred_element_type=jnp.float32)            # (M, E) f32

    # --- sqrt(E) scale + positional encoding (tiled over the batch in-kernel) ---
    pos = jnp.broadcast_to(pos_ref[...][None], (B, S, E)).reshape(M, E)
    x = emb * jnp.float32(math.sqrt(E)) + pos
    # TODO(synk): dropout omitted (eval-mode identity; stochastic in training).

    # --- additive attention mask, shared by all layers/heads: (H*B, S, S) ---
    mask_nb = src_mask_ref[...][None, :, :] + pad_ref[0][:, None, :]   # (B,S,S)
    mask = jnp.broadcast_to(mask_nb[None], (H, B, S, S)).reshape(H * B, S, S)

    inv_sqrt_dh = jnp.float32(1.0 / math.sqrt(HEAD_DIM))

    for l in range(NUM_LAYERS):                                  # static unroll
        # ------------- self attention (head-batched, no lane slicing) -------
        w_qkv = w_qkv_ref[l]                                     # (3H, E, hd) bf16
        b_qkv = b_qkv_ref[l]                                     # (3H, 1, hd) f32
        w_out = w_out_ref[l]                                     # (H, hd, E) bf16

        xb = jnp.broadcast_to(x.astype(jnp.bfloat16)[None], (3 * H, M, E))
        qkv = jnp.einsum('bme,bed->bmd', xb, w_qkv,
                         preferred_element_type=jnp.float32) + b_qkv
        q = qkv[0:H].reshape(H * B, S, HEAD_DIM)                 # (H*B, S, hd)
        k = qkv[H:2 * H].reshape(H * B, S, HEAD_DIM)
        v = qkv[2 * H:3 * H].reshape(H * B, S, HEAD_DIM)

        # scores / softmax / values stay f32 for precision (K never transposed).
        s = jnp.einsum('bqd,bkd->bqk', q, k,
                       preferred_element_type=jnp.float32) * inv_sqrt_dh + mask
        s = s - jnp.max(s, axis=-1, keepdims=True)
        p = jnp.exp(s)
        p = p / jnp.sum(p, axis=-1, keepdims=True)               # exact divide
        o = jnp.einsum('bqk,bkd->bqd', p, v,
                       preferred_element_type=jnp.float32)       # (H*B, S, hd)
        o = o.reshape(H, M, HEAD_DIM)

        # Head merge folded into the output projection: attn = b + sum_h o_h @ W_h
        attn = b_out_ref[l]                                      # (1, E), broadcasts
        for h in range(H):
            attn = attn + jnp.dot(o[h].astype(jnp.bfloat16), w_out[h],
                                  preferred_element_type=jnp.float32)
        x = _layernorm(x + attn, ln1_g_ref[l], ln1_b_ref[l])

        # ------------- feed forward -------------
        ff = jnp.maximum(_dot_bf16(x, w_ff1_ref[l]) + b_ff1_ref[l], 0.0)
        ff = _dot_bf16(ff, w_ff2_ref[l]) + b_ff2_ref[l]
        x = _layernorm(x + ff, ln2_g_ref[l], ln2_b_ref[l])

    # --- lane-dense store: pack (B*S, E) -> (B, S*E) (last dim 256 = 2x128) ---
    rows = [jnp.concatenate([x[b * S + s0: b * S + s0 + 1, :]
                             for s0 in range(S)], axis=1)        # (1, S*E)
            for b in range(B)]
    packed = rows[0] if B == 1 else jnp.concatenate(rows, axis=0)
    o_ref[0] = packed.astype(o_ref.dtype)


# ---------------------------------------------------------------------------
# Wrapper
# ---------------------------------------------------------------------------
def senti_transformer_forward(params, tokens, src_mask, key_padding_mask):
    """tokens: (S, N) int; src_mask: (S, S) additive float;
    key_padding_mask: (N, S) bool (True = masked).  Returns (S, N, E)."""
    S, N = tokens.shape
    E = D_MODEL
    L = NUM_LAYERS
    H = N_HEAD
    lp = params["layers"]

    # Batch folded into G grid steps (one batch tile per v7x TensorCore).
    G = 2 if N >= 2 else 1
    B = -(-N // G)                      # ceil
    N_pad = G * B

    tok = tokens.T.astype(jnp.int32)                                # (N, S)
    pad = jnp.where(key_padding_mask, jnp.float32(NEG_INF),
                    jnp.float32(0.0))                               # (N, S)
    if N_pad != N:
        tok = jnp.pad(tok, ((0, N_pad - N), (0, 0)))
        pad = jnp.pad(pad, ((0, N_pad - N), (0, 0)))
    tok3 = tok.reshape(G, B * S, 1)                                 # (G, M, 1)
    pad3 = pad.reshape(G, B, S)                                     # (G, B, S)
    pos = params["pos_embedding"][:S, 0, :]                         # (S, E)

    def rep(shape):                     # replicated full-array block
        nd = len(shape)
        return pl.BlockSpec(shape, lambda g, _nd=nd: (0,) * _nd)

    in_specs = [
        pl.BlockSpec((1, B * S, 1), lambda g: (g, 0, 0)),   # tokens (per tile)
        rep((VOCAB_PAD, E)),                                 # emb table (padded)
        rep((S, E)),                                         # positional encoding
        rep((S, S)),                                         # src_mask
        pl.BlockSpec((1, B, S), lambda g: (g, 0, 0)),        # pad rows (per tile)
        rep((L, 3 * H, E, HEAD_DIM)), rep((L, 3 * H, 1, HEAD_DIM)),  # w/b qkv
        rep((L, H, HEAD_DIM, E)),     rep((L, 1, E)),                 # w/b out
        rep((L, E, DIM_FF)),          rep((L, 1, DIM_FF)),            # w/b ff1
        rep((L, DIM_FF, E)),          rep((L, 1, E)),                 # w/b ff2
        rep((L, 1, E)), rep((L, 1, E)),                               # ln1 g/b
        rep((L, 1, E)), rep((L, 1, E)),                               # ln2 g/b
    ]
    out_spec = pl.BlockSpec((1, B, S * E), lambda g: (g, 0, 0))  # lane-dense

    out = pl.pallas_call(
        _encoder_fwd_kernel,
        out_shape=jax.ShapeDtypeStruct((G, B, S * E), jnp.float32),
        grid=(G,),
        in_specs=in_specs,
        out_specs=out_spec,
        compiler_params=pltpu.CompilerParams(
            dimension_semantics=("parallel",)),
    )(tok3, params["emb_table"], pos, src_mask.astype(jnp.float32), pad3,
      lp["w_qkv"], lp["b_qkv"], lp["w_out"], lp["b_out"],
      lp["w_ff1"], lp["b_ff1"], lp["w_ff2"], lp["b_ff2"],
      lp["ln1_g"], lp["ln1_b"], lp["ln2_g"], lp["ln2_b"])

    out = out.reshape(N_pad, S, E)[:N]          # free view of the lane-dense slab
    # Seq-first to match the PyTorch module; at production scale let the consumer
    # take batch-first instead and drop this transpose (extra HBM round trip).
    return jnp.transpose(out, (1, 0, 2))        # (S, N, E)


# ---------------------------------------------------------------------------
# Deterministic parameter initialization (shapes from the module's __init__)
# ---------------------------------------------------------------------------
def init_params(key):
    keys = jax.random.split(key, 1 + NUM_LAYERS)

    def dense(k, shape, dtype=jnp.float32):
        return (jax.random.normal(k, shape, jnp.float32) * 0.02).astype(dtype)

    # Embedding table, row-padded 19 -> 32 (padded rows are never selected).
    emb = dense(keys[0], (VOCAB, D_MODEL))
    emb = jnp.pad(emb, ((0, VOCAB_PAD - VOCAB), (0, 0)))
    params = {"emb_table": emb.astype(jnp.bfloat16)}

    # PositionalEncoding buffer: (maxlen, 1, E), same construction as PyTorch.
    den = jnp.exp(-jnp.arange(0, D_MODEL, 2, dtype=jnp.float32)
                  * (math.log(10000.0) / D_MODEL))
    pos = jnp.arange(0, MAXLEN, dtype=jnp.float32).reshape(MAXLEN, 1)
    pe = jnp.zeros((MAXLEN, D_MODEL), jnp.float32)
    pe = pe.at[:, 0::2].set(jnp.sin(pos * den))
    pe = pe.at[:, 1::2].set(jnp.cos(pos * den))
    params["pos_embedding"] = pe[:, None, :]

    H, hd, L = N_HEAD, HEAD_DIM, NUM_LAYERS
    lk = [jax.random.split(keys[1 + li], 4) for li in range(L)]

    def stack(fn):
        return jnp.stack([fn(li) for li in range(L)], axis=0)

    # Pre-laid-out head-major projection weights so the kernel needs no lane
    # slicing / transposes / concatenation:
    #   w_qkv[l, t*H + h] == in_proj_weight[t*E + h*hd : t*E + (h+1)*hd, :].T
    #   w_out[l, h]       == out_proj.weight[:, h*hd : (h+1)*hd].T
    def qkv_head_major(w):          # (E, 3E) x@W layout -> (3H, E, hd)
        return (w.reshape(D_MODEL, 3, H, hd)
                 .transpose(1, 2, 0, 3)
                 .reshape(3 * H, D_MODEL, hd))

    def out_head_major(w):          # (E, E) x@W layout -> (H, hd, E)
        return w.reshape(H, hd, D_MODEL)

    params["layers"] = {
        "w_qkv": stack(lambda li: qkv_head_major(
            dense(lk[li][0], (D_MODEL, 3 * D_MODEL)))).astype(jnp.bfloat16),
        "b_qkv": jnp.zeros((L, 3 * H, 1, hd), jnp.float32),
        "w_out": stack(lambda li: out_head_major(
            dense(lk[li][1], (D_MODEL, D_MODEL)))).astype(jnp.bfloat16),
        "b_out": jnp.zeros((L, 1, D_MODEL), jnp.float32),
        "w_ff1": stack(lambda li: dense(lk[li][2], (D_MODEL, DIM_FF),
                                        jnp.bfloat16)),
        "b_ff1": jnp.full((L, 1, DIM_FF), 0.01, jnp.float32),
        "w_ff2": stack(lambda li: dense(lk[li][3], (DIM_FF, D_MODEL),
                                        jnp.bfloat16)),
        "b_ff2": jnp.zeros((L, 1, D_MODEL), jnp.float32),
        "ln1_g": jnp.ones((L, 1, D_MODEL), jnp.float32),
        "ln1_b": jnp.zeros((L, 1, D_MODEL), jnp.float32),
        "ln2_g": jnp.ones((L, 1, D_MODEL), jnp.float32),
        "ln2_b": jnp.zeros((L, 1, D_MODEL), jnp.float32),
    }
    return params


if __name__ == "__main__":
    key = jax.random.PRNGKey(0)
    k_tok, k_par = jax.random.split(key)
    S, N = 8, 2
    tokens = jax.random.randint(k_tok, (S, N), 0, VOCAB)
    src_mask = jnp.zeros((S, S), jnp.float32)                  # additive float mask
    key_padding_mask = jnp.zeros((N, S), jnp.bool_)
    key_padding_mask = key_padding_mask.at[1, -2:].set(True)   # mask some padding

    params = init_params(k_par)
    fwd = jax.jit(senti_transformer_forward)
    out = fwd(params, tokens, src_mask, key_padding_mask)
    jax.block_until_ready(out)
    assert out.shape == (S, N, D_MODEL)
    assert bool(jnp.all(jnp.isfinite(out)))
    print("KERNEL_OK")
</pallas_src>

<mosaic_0001>
module attributes {stable_mosaic.version = 11 : i64} {
  func.func @_encoder_fwd_kernel(%arg0: i32, %arg1: memref<1x8x1xi32, #tpu.memory_space<vmem>>, %arg2: memref<32x32xbf16, #tpu.memory_space<vmem>>, %arg3: memref<8x32xf32, #tpu.memory_space<vmem>>, %arg4: memref<8x8xf32, #tpu.memory_space<vmem>>, %arg5: memref<1x1x8xf32, #tpu.memory_space<vmem>>, %arg6: memref<2x12x32x8xbf16, #tpu.memory_space<vmem>>, %arg7: memref<2x12x1x8xf32, #tpu.memory_space<vmem>>, %arg8: memref<2x4x8x32xbf16, #tpu.memory_space<vmem>>, %arg9: memref<2x1x32xf32, #tpu.memory_space<vmem>>, %arg10: memref<2x32x64xbf16, #tpu.memory_space<vmem>>, %arg11: memref<2x1x64xf32, #tpu.memory_space<vmem>>, %arg12: memref<2x64x32xbf16, #tpu.memory_space<vmem>>, %arg13: memref<2x1x32xf32, #tpu.memory_space<vmem>>, %arg14: memref<2x1x32xf32, #tpu.memory_space<vmem>>, %arg15: memref<2x1x32xf32, #tpu.memory_space<vmem>>, %arg16: memref<2x1x32xf32, #tpu.memory_space<vmem>>, %arg17: memref<2x1x32xf32, #tpu.memory_space<vmem>>, %arg18: memref<1x1x256xf32, #tpu.memory_space<vmem>>) attributes {dimension_semantics = [#tpu.dimension_semantics<parallel>], iteration_bounds = array<i64: 2>, scalar_prefetch = 0 : i64, scratch_operands = 0 : i64, tpu.core_type = #tpu.core_type<tc>, window_params = [{transform_indices = @transform_0, window_bounds = array<i64: 1, 8, 1>}, {pipeline_mode = #tpu.pipeline_mode<synchronous>, transform_indices = @transform_1, window_bounds = array<i64: 32, 32>}, {pipeline_mode = #tpu.pipeline_mode<synchronous>, transform_indices = @transform_2, window_bounds = array<i64: 8, 32>}, {pipeline_mode = #tpu.pipeline_mode<synchronous>, transform_indices = @transform_3, window_bounds = array<i64: 8, 8>}, {transform_indices = @transform_4, window_bounds = array<i64: 1, 1, 8>}, {pipeline_mode = #tpu.pipeline_mode<synchronous>, transform_indices = @transform_5, window_bounds = array<i64: 2, 12, 32, 8>}, {pipeline_mode = #tpu.pipeline_mode<synchronous>, transform_indices = @transform_6, window_bounds = array<i64: 2, 12, 1, 8>}, {pipeline_mode = #tpu.pipeline_mode<synchronous>, transform_indices = @transform_7, window_bounds = array<i64: 2, 4, 8, 32>}, {pipeline_mode = #tpu.pipeline_mode<synchronous>, transform_indices = @transform_8, window_bounds = array<i64: 2, 1, 32>}, {pipeline_mode = #tpu.pipeline_mode<synchronous>, transform_indices = @transform_9, window_bounds = array<i64: 2, 32, 64>}, {pipeline_mode = #tpu.pipeline_mode<synchronous>, transform_indices = @transform_10, window_bounds = array<i64: 2, 1, 64>}, {pipeline_mode = #tpu.pipeline_mode<synchronous>, transform_indices = @transform_11, window_bounds = array<i64: 2, 64, 32>}, {pipeline_mode = #tpu.pipeline_mode<synchronous>, transform_indices = @transform_12, window_bounds = array<i64: 2, 1, 32>}, {pipeline_mode = #tpu.pipeline_mode<synchronous>, transform_indices = @transform_13, window_bounds = array<i64: 2, 1, 32>}, {pipeline_mode = #tpu.pipeline_mode<synchronous>, transform_indices = @transform_14, window_bounds = array<i64: 2, 1, 32>}, {pipeline_mode = #tpu.pipeline_mode<synchronous>, transform_indices = @transform_15, window_bounds = array<i64: 2, 1, 32>}, {pipeline_mode = #tpu.pipeline_mode<synchronous>, transform_indices = @transform_16, window_bounds = array<i64: 2, 1, 32>}, {transform_indices = @transform_17, window_bounds = array<i64: 1, 1, 256>}]} {
    %c0 = arith.constant 0 : index
    %c0_0 = arith.constant 0 : index
    %c0_1 = arith.constant 0 : index
    %0 = vector.load %arg1[%c0, %c0_0, %c0_1] : memref<1x8x1xi32, #tpu.memory_space<vmem>>, vector<1x8x1xi32>
    %1 = vector.shape_cast %0 : vector<1x8x1xi32> to vector<8x1xi32>
    %2 = tpu.iota {dimensions = array<i32: 1>} : vector<8x32xi32>
    %3 = vector.broadcast %1 : vector<8x1xi32> to vector<8x32xi32>
    %4 = arith.cmpi eq, %3, %2 : vector<8x32xi32>
    %5 = arith.extui %4 : vector<8x32xi1> to vector<8x32xi32>
    %6 = arith.sitofp %5 : vector<8x32xi32> to vector<8x32xf32>
    %7 = arith.truncf %6 : vector<8x32xf32> to vector<8x32xbf16>
    %c0_2 = arith.constant 0 : index
    %c0_3 = arith.constant 0 : index
    %8 = vector.load %arg2[%c0_2, %c0_3] : memref<32x32xbf16, #tpu.memory_space<vmem>>, vector<32x32xbf16>
    %cst = arith.constant dense<0.000000e+00> : vector<8x32xf32>
    %9 = tpu.matmul %7, %8, %cst {dimension_numbers = #tpu.dot_dimension_numbers<[1], [0], [0], [1], [0, 0, 1, 1], [], []>} : vector<8x32xbf16>, vector<32x32xbf16>, vector<8x32xf32> -> vector<8x32xf32>
    %c0_4 = arith.constant 0 : index
    %c0_5 = arith.constant 0 : index
    %10 = vector.load %arg3[%c0_4, %c0_5] : memref<8x32xf32, #tpu.memory_space<vmem>>, vector<8x32xf32>
    %11 = vector.shape_cast %10 : vector<8x32xf32> to vector<1x8x32xf32>
    %12 = vector.shape_cast %11 : vector<1x8x32xf32> to vector<8x32xf32>
    %cst_6 = arith.constant 5.65685415 : f32
    %13 = vector.broadcast %cst_6 : f32 to vector<8x32xf32>
    %14 = arith.mulf %9, %13 : vector<8x32xf32>
    %15 = arith.addf %14, %12 : vector<8x32xf32>
    %c0_7 = arith.constant 0 : index
    %c0_8 = arith.constant 0 : index
    %16 = vector.load %arg4[%c0_7, %c0_8] : memref<8x8xf32, #tpu.memory_space<vmem>>, vector<8x8xf32>
    %17 = vector.shape_cast %16 : vector<8x8xf32> to vector<1x8x8xf32>
    %c0_9 = arith.constant 0 : index
    %c0_10 = arith.constant 0 : index
    %c0_11 = arith.constant 0 : index
    %18 = vector.load %arg5[%c0_9, %c0_10, %c0_11] : memref<1x1x8xf32, #tpu.memory_space<vmem>>, vector<1x1x8xf32>
    %19 = vector.shape_cast %18 : vector<1x1x8xf32> to vector<1x8xf32>
    %20 = vector.shape_cast %19 : vector<1x8xf32> to vector<1x1x8xf32>
    %21 = vector.broadcast %20 : vector<1x1x8xf32> to vector<1x8x8xf32>
    %22 = arith.addf %17, %21 : vector<1x8x8xf32>
    %23 = vector.shape_cast %22 : vector<1x8x8xf32> to vector<1x1x8x8xf32>
    %24 = vector.shape_cast %23 : vector<1x1x8x8xf32> to vector<1x1x8x8xf32>
    %25 = vector.broadcast %24 : vector<1x1x8x8xf32> to vector<4x1x8x8xf32>
    %26 = vector.shape_cast %25 : vector<4x1x8x8xf32> to vector<4x8x8xf32>
    %c0_12 = arith.constant 0 : index
    %c0_13 = arith.constant 0 : index
    %c0_14 = arith.constant 0 : index
    %c0_15 = arith.constant 0 : index
    %27 = vector.load %arg6[%c0_12, %c0_13, %c0_14, %c0_15] : memref<2x12x32x8xbf16, #tpu.memory_space<vmem>>, vector<1x12x32x8xbf16>
    %28 = vector.shape_cast %27 : vector<1x12x32x8xbf16> to vector<12x32x8xbf16>
    %c0_16 = arith.constant 0 : index
    %c0_17 = arith.constant 0 : index
    %c0_18 = arith.constant 0 : index
    %c0_19 = arith.constant 0 : index
    %29 = vector.load %arg7[%c0_16, %c0_17, %c0_18, %c0_19] : memref<2x12x1x8xf32, #tpu.memory_space<vmem>>, vector<1x12x1x8xf32>
    %30 = vector.shape_cast %29 : vector<1x12x1x8xf32> to vector<12x1x8xf32>
    %c0_20 = arith.constant 0 : index
    %c0_21 = arith.constant 0 : index
    %c0_22 = arith.constant 0 : index
    %c0_23 = arith.constant 0 : index
    %31 = vector.load %arg8[%c0_20, %c0_21, %c0_22, %c0_23] : memref<2x4x8x32xbf16, #tpu.memory_space<vmem>>, vector<1x4x8x32xbf16>
    %32 = vector.shape_cast %31 : vector<1x4x8x32xbf16> to vector<4x8x32xbf16>
    %33 = arith.truncf %15 : vector<8x32xf32> to vector<8x32xbf16>
    %34 = vector.shape_cast %33 : vector<8x32xbf16> to vector<1x8x32xbf16>
    %35 = vector.shape_cast %34 : vector<1x8x32xbf16> to vector<1x8x32xbf16>
    %36 = vector.broadcast %35 : vector<1x8x32xbf16> to vector<12x8x32xbf16>
    "tpu.trace_start"() <{level = 10 : i32, message = "bme,bed->bmd"}> : () -> ()
    %cst_24 = arith.constant dense<0.000000e+00> : vector<12x8x8xf32>
    %37 = tpu.matmul %36, %28, %cst_24 {dimension_numbers = #tpu.dot_dimension_numbers<[2], [1], [1], [2], [0, 0, 0, 1, 1, 2], [0], [0]>} : vector<12x8x32xbf16>, vector<12x32x8xbf16>, vector<12x8x8xf32> -> vector<12x8x8xf32>
    "tpu.trace_stop"() : () -> ()
    %38 = vector.broadcast %30 : vector<12x1x8xf32> to vector<12x8x8xf32>
    %39 = arith.addf %37, %38 : vector<12x8x8xf32>
    %40 = vector.extract_strided_slice %39 {offsets = [0, 0, 0], sizes = [4, 8, 8], strides = [1, 1, 1]} : vector<12x8x8xf32> to vector<4x8x8xf32>
    %41 = vector.extract_strided_slice %39 {offsets = [4, 0, 0], sizes = [4, 8, 8], strides = [1, 1, 1]} : vector<12x8x8xf32> to vector<4x8x8xf32>
    %42 = vector.extract_strided_slice %39 {offsets = [8, 0, 0], sizes = [4, 8, 8], strides = [1, 1, 1]} : vector<12x8x8xf32> to vector<4x8x8xf32>
    "tpu.trace_start"() <{level = 10 : i32, message = "bqd,bkd->bqk"}> : () -> ()
    %cst_25 = arith.constant dense<0.000000e+00> : vector<4x8x8xf32>
    %43 = tpu.matmul %40, %41, %cst_25 {dimension_numbers = #tpu.dot_dimension_numbers<[2], [2], [1], [1], [0, 0, 0, 1, 1, 1], [0], [0]>} : vector<4x8x8xf32>, vector<4x8x8xf32>, vector<4x8x8xf32> -> vector<4x8x8xf32>
    "tpu.trace_stop"() : () -> ()
    %cst_26 = arith.constant 0.353553385 : f32
    %44 = vector.broadcast %cst_26 : f32 to vector<4x8x8xf32>
    %45 = arith.mulf %43, %44 : vector<4x8x8xf32>
    %46 = arith.addf %45, %26 : vector<4x8x8xf32>
    %cst_27 = arith.constant dense<0xFF800000> : vector<4x8xf32>
    %47 = vector.multi_reduction <maximumf>, %46, %cst_27 [2] : vector<4x8x8xf32> to vector<4x8xf32>
    %48 = vector.shape_cast %47 : vector<4x8xf32> to vector<4x8x1xf32>
    %49 = vector.broadcast %48 : vector<4x8x1xf32> to vector<4x8x8xf32>
    %50 = arith.subf %46, %49 : vector<4x8x8xf32>
    %51 = math.exp %50 : vector<4x8x8xf32>
    %cst_28 = arith.constant dense<0.000000e+00> : vector<4x8xf32>
    %52 = vector.multi_reduction <add>, %51, %cst_28 [2] : vector<4x8x8xf32> to vector<4x8xf32>
    %53 = vector.shape_cast %52 : vector<4x8xf32> to vector<4x8x1xf32>
    %54 = vector.broadcast %53 : vector<4x8x1xf32> to vector<4x8x8xf32>
    %55 = arith.divf %51, %54 : vector<4x8x8xf32>
    "tpu.trace_start"() <{level = 10 : i32, message = "bqk,bkd->bqd"}> : () -> ()
    %cst_29 = arith.constant dense<0.000000e+00> : vector<4x8x8xf32>
    %56 = tpu.matmul %55, %42, %cst_29 {dimension_numbers = #tpu.dot_dimension_numbers<[2], [1], [1], [2], [0, 0, 0, 1, 1, 2], [0], [0]>} : vector<4x8x8xf32>, vector<4x8x8xf32>, vector<4x8x8xf32> -> vector<4x8x8xf32>
    "tpu.trace_stop"() : () -> ()
    %c0_30 = arith.constant 0 : index
    %c0_31 = arith.constant 0 : index
    %c0_32 = arith.constant 0 : index
    %57 = vector.load %arg9[%c0_30, %c0_31, %c0_32] : memref<2x1x32xf32, #tpu.memory_space<vmem>>, vector<1x1x32xf32>
    %58 = vector.shape_cast %57 : vector<1x1x32xf32> to vector<1x32xf32>
    %59 = vector.extract_strided_slice %56 {offsets = [0, 0, 0], sizes = [1, 8, 8], strides = [1, 1, 1]} : vector<4x8x8xf32> to vector<1x8x8xf32>
    %60 = vector.shape_cast %59 : vector<1x8x8xf32> to vector<8x8xf32>
    %61 = arith.truncf %60 : vector<8x8xf32> to vector<8x8xbf16>
    %62 = vector.extract_strided_slice %32 {offsets = [0, 0, 0], sizes = [1, 8, 32], strides = [1, 1, 1]} : vector<4x8x32xbf16> to vector<1x8x32xbf16>
    %63 = vector.shape_cast %62 : vector<1x8x32xbf16> to vector<8x32xbf16>
    %cst_33 = arith.constant dense<0.000000e+00> : vector<8x32xf32>
    %64 = tpu.matmul %61, %63, %cst_33 {dimension_numbers = #tpu.dot_dimension_numbers<[1], [0], [0], [1], [0, 0, 1, 1], [], []>} : vector<8x8xbf16>, vector<8x32xbf16>, vector<8x32xf32> -> vector<8x32xf32>
    %65 = vector.broadcast %58 : vector<1x32xf32> to vector<8x32xf32>
    %66 = arith.addf %65, %64 : vector<8x32xf32>
    %67 = vector.extract_strided_slice %56 {offsets = [1, 0, 0], sizes = [1, 8, 8], strides = [1, 1, 1]} : vector<4x8x8xf32> to vector<1x8x8xf32>
    %68 = vector.shape_cast %67 : vector<1x8x8xf32> to vector<8x8xf32>
    %69 = arith.truncf %68 : vector<8x8xf32> to vector<8x8xbf16>
    %70 = vector.extract_strided_slice %32 {offsets = [1, 0, 0], sizes = [1, 8, 32], strides = [1, 1, 1]} : vector<4x8x32xbf16> to vector<1x8x32xbf16>
    %71 = vector.shape_cast %70 : vector<1x8x32xbf16> to vector<8x32xbf16>
    %cst_34 = arith.constant dense<0.000000e+00> : vector<8x32xf32>
    %72 = tpu.matmul %69, %71, %cst_34 {dimension_numbers = #tpu.dot_dimension_numbers<[1], [0], [0], [1], [0, 0, 1, 1], [], []>} : vector<8x8xbf16>, vector<8x32xbf16>, vector<8x32xf32> -> vector<8x32xf32>
    %73 = arith.addf %66, %72 : vector<8x32xf32>
    %74 = vector.extract_strided_slice %56 {offsets = [2, 0, 0], sizes = [1, 8, 8], strides = [1, 1, 1]} : vector<4x8x8xf32> to vector<1x8x8xf32>
    %75 = vector.shape_cast %74 : vector<1x8x8xf32> to vector<8x8xf32>
    %76 = arith.truncf %75 : vector<8x8xf32> to vector<8x8xbf16>
    %77 = vector.extract_strided_slice %32 {offsets = [2, 0, 0], sizes = [1, 8, 32], strides = [1, 1, 1]} : vector<4x8x32xbf16> to vector<1x8x32xbf16>
    %78 = vector.shape_cast %77 : vector<1x8x32xbf16> to vector<8x32xbf16>
    %cst_35 = arith.constant dense<0.000000e+00> : vector<8x32xf32>
    %79 = tpu.matmul %76, %78, %cst_35 {dimension_numbers = #tpu.dot_dimension_numbers<[1], [0], [0], [1], [0, 0, 1, 1], [], []>} : vector<8x8xbf16>, vector<8x32xbf16>, vector<8x32xf32> -> vector<8x32xf32>
    %80 = arith.addf %73, %79 : vector<8x32xf32>
    %81 = vector.extract_strided_slice %56 {offsets = [3, 0, 0], sizes = [1, 8, 8], strides = [1, 1, 1]} : vector<4x8x8xf32> to vector<1x8x8xf32>
    %82 = vector.shape_cast %81 : vector<1x8x8xf32> to vector<8x8xf32>
    %83 = arith.truncf %82 : vector<8x8xf32> to vector<8x8xbf16>
    %84 = vector.extract_strided_slice %32 {offsets = [3, 0, 0], sizes = [1, 8, 32], strides = [1, 1, 1]} : vector<4x8x32xbf16> to vector<1x8x32xbf16>
    %85 = vector.shape_cast %84 : vector<1x8x32xbf16> to vector<8x32xbf16>
    %cst_36 = arith.constant dense<0.000000e+00> : vector<8x32xf32>
    %86 = tpu.matmul %83, %85, %cst_36 {dimension_numbers = #tpu.dot_dimension_numbers<[1], [0], [0], [1], [0, 0, 1, 1], [], []>} : vector<8x8xbf16>, vector<8x32xbf16>, vector<8x32xf32> -> vector<8x32xf32>
    %87 = arith.addf %80, %86 : vector<8x32xf32>
    %88 = arith.addf %15, %87 : vector<8x32xf32>
    %c0_37 = arith.constant 0 : index
    %c0_38 = arith.constant 0 : index
    %c0_39 = arith.constant 0 : index
    %89 = vector.load %arg14[%c0_37, %c0_38, %c0_39] : memref<2x1x32xf32, #tpu.memory_space<vmem>>, vector<1x1x32xf32>
    %90 = vector.shape_cast %89 : vector<1x1x32xf32> to vector<1x32xf32>
    %c0_40 = arith.constant 0 : index
    %c0_41 = arith.constant 0 : index
    %c0_42 = arith.constant 0 : index
    %91 = vector.load %arg15[%c0_40, %c0_41, %c0_42] : memref<2x1x32xf32, #tpu.memory_space<vmem>>, vector<1x1x32xf32>
    %92 = vector.shape_cast %91 : vector<1x1x32xf32> to vector<1x32xf32>
    %cst_43 = arith.constant dense<0.000000e+00> : vector<8xf32>
    %93 = vector.multi_reduction <add>, %88, %cst_43 [1] : vector<8x32xf32> to vector<8xf32>
    %94 = vector.shape_cast %93 : vector<8xf32> to vector<8x1xf32>
    %cst_44 = arith.constant 3.200000e+01 : f32
    %95 = vector.broadcast %cst_44 : f32 to vector<8x1xf32>
    %96 = arith.divf %94, %95 : vector<8x1xf32>
    %97 = vector.broadcast %96 : vector<8x1xf32> to vector<8x32xf32>
    %98 = arith.subf %88, %97 : vector<8x32xf32>
    %99 = arith.mulf %98, %98 : vector<8x32xf32>
    %cst_45 = arith.constant dense<0.000000e+00> : vector<8xf32>
    %100 = vector.multi_reduction <add>, %99, %cst_45 [1] : vector<8x32xf32> to vector<8xf32>
    %101 = vector.shape_cast %100 : vector<8xf32> to vector<8x1xf32>
    %cst_46 = arith.constant 3.200000e+01 : f32
    %102 = vector.broadcast %cst_46 : f32 to vector<8x1xf32>
    %103 = arith.divf %101, %102 : vector<8x1xf32>
    %104 = vector.broadcast %96 : vector<8x1xf32> to vector<8x32xf32>
    %105 = arith.subf %88, %104 : vector<8x32xf32>
    %cst_47 = arith.constant 9.99999974E-6 : f32
    %106 = vector.broadcast %cst_47 : f32 to vector<8x1xf32>
    %107 = arith.addf %103, %106 : vector<8x1xf32>
    %108 = math.rsqrt %107 : vector<8x1xf32>
    %109 = vector.broadcast %108 : vector<8x1xf32> to vector<8x32xf32>
    %110 = arith.mulf %105, %109 : vector<8x32xf32>
    %111 = vector.broadcast %90 : vector<1x32xf32> to vector<8x32xf32>
    %112 = arith.mulf %110, %111 : vector<8x32xf32>
    %113 = vector.broadcast %92 : vector<1x32xf32> to vector<8x32xf32>
    %114 = arith.addf %112, %113 : vector<8x32xf32>
    %c0_48 = arith.constant 0 : index
    %c0_49 = arith.constant 0 : index
    %c0_50 = arith.constant 0 : index
    %115 = vector.load %arg10[%c0_48, %c0_49, %c0_50] : memref<2x32x64xbf16, #tpu.memory_space<vmem>>, vector<1x32x64xbf16>
    %116 = vector.shape_cast %115 : vector<1x32x64xbf16> to vector<32x64xbf16>
    %117 = arith.truncf %114 : vector<8x32xf32> to vector<8x32xbf16>
    %cst_51 = arith.constant dense<0.000000e+00> : vector<8x64xf32>
    %118 = tpu.matmul %117, %116, %cst_51 {dimension_numbers = #tpu.dot_dimension_numbers<[1], [0], [0], [1], [0, 0, 1, 1], [], []>} : vector<8x32xbf16>, vector<32x64xbf16>, vector<8x64xf32> -> vector<8x64xf32>
    %c0_52 = arith.constant 0 : index
    %c0_53 = arith.constant 0 : index
    %c0_54 = arith.constant 0 : index
    %119 = vector.load %arg11[%c0_52, %c0_53, %c0_54] : memref<2x1x64xf32, #tpu.memory_space<vmem>>, vector<1x1x64xf32>
    %120 = vector.shape_cast %119 : vector<1x1x64xf32> to vector<1x64xf32>
    %121 = vector.broadcast %120 : vector<1x64xf32> to vector<8x64xf32>
    %122 = arith.addf %118, %121 : vector<8x64xf32>
    %cst_55 = arith.constant 0.000000e+00 : f32
    %123 = vector.broadcast %cst_55 : f32 to vector<8x64xf32>
    %124 = arith.maximumf %122, %123 : vector<8x64xf32>
    %c0_56 = arith.constant 0 : index
    %c0_57 = arith.constant 0 : index
    %c0_58 = arith.constant 0 : index
    %125 = vector.load %arg12[%c0_56, %c0_57, %c0_58] : memref<2x64x32xbf16, #tpu.memory_space<vmem>>, vector<1x64x32xbf16>
    %126 = vector.shape_cast %125 : vector<1x64x32xbf16> to vector<64x32xbf16>
    %127 = arith.truncf %124 : vector<8x64xf32> to vector<8x64xbf16>
    %cst_59 = arith.constant dense<0.000000e+00> : vector<8x32xf32>
    %128 = tpu.matmul %127, %126, %cst_59 {dimension_numbers = #tpu.dot_dimension_numbers<[1], [0], [0], [1], [0, 0, 1, 1], [], []>} : vector<8x64xbf16>, vector<64x32xbf16>, vector<8x32xf32> -> vector<8x32xf32>
    %c0_60 = arith.constant 0 : index
    %c0_61 = arith.constant 0 : index
    %c0_62 = arith.constant 0 : index
    %129 = vector.load %arg13[%c0_60, %c0_61, %c0_62] : memref<2x1x32xf32, #tpu.memory_space<vmem>>, vector<1x1x32xf32>
    %130 = vector.shape_cast %129 : vector<1x1x32xf32> to vector<1x32xf32>
    %131 = vector.broadcast %130 : vector<1x32xf32> to vector<8x32xf32>
    %132 = arith.addf %128, %131 : vector<8x32xf32>
    %133 = arith.addf %114, %132 : vector<8x32xf32>
    %c0_63 = arith.constant 0 : index
    %c0_64 = arith.constant 0 : index
    %c0_65 = arith.constant 0 : index
    %134 = vector.load %arg16[%c0_63, %c0_64, %c0_65] : memref<2x1x32xf32, #tpu.memory_space<vmem>>, vector<1x1x32xf32>
    %135 = vector.shape_cast %134 : vector<1x1x32xf32> to vector<1x32xf32>
    %c0_66 = arith.constant 0 : index
    %c0_67 = arith.constant 0 : index
    %c0_68 = arith.constant 0 : index
    %136 = vector.load %arg17[%c0_66, %c0_67, %c0_68] : memref<2x1x32xf32, #tpu.memory_space<vmem>>, vector<1x1x32xf32>
    %137 = vector.shape_cast %136 : vector<1x1x32xf32> to vector<1x32xf32>
    %cst_69 = arith.constant dense<0.000000e+00> : vector<8xf32>
    %138 = vector.multi_reduction <add>, %133, %cst_69 [1] : vector<8x32xf32> to vector<8xf32>
    %139 = vector.shape_cast %138 : vector<8xf32> to vector<8x1xf32>
    %cst_70 = arith.constant 3.200000e+01 : f32
    %140 = vector.broadcast %cst_70 : f32 to vector<8x1xf32>
    %141 = arith.divf %139, %140 : vector<8x1xf32>
    %142 = vector.broadcast %141 : vector<8x1xf32> to vector<8x32xf32>
    %143 = arith.subf %133, %142 : vector<8x32xf32>
    %144 = arith.mulf %143, %143 : vector<8x32xf32>
    %cst_71 = arith.constant dense<0.000000e+00> : vector<8xf32>
    %145 = vector.multi_reduction <add>, %144, %cst_71 [1] : vector<8x32xf32> to vector<8xf32>
    %146 = vector.shape_cast %145 : vector<8xf32> to vector<8x1xf32>
    %cst_72 = arith.constant 3.200000e+01 : f32
    %147 = vector.broadcast %cst_72 : f32 to vector<8x1xf32>
    %148 = arith.divf %146, %147 : vector<8x1xf32>
    %149 = vector.broadcast %141 : vector<8x1xf32> to vector<8x32xf32>
    %150 = arith.subf %133, %149 : vector<8x32xf32>
    %cst_73 = arith.constant 9.99999974E-6 : f32
    %151 = vector.broadcast %cst_73 : f32 to vector<8x1xf32>
    %152 = arith.addf %148, %151 : vector<8x1xf32>
    %153 = math.rsqrt %152 : vector<8x1xf32>
    %154 = vector.broadcast %153 : vector<8x1xf32> to vector<8x32xf32>
    %155 = arith.mulf %150, %154 : vector<8x32xf32>
    %156 = vector.broadcast %135 : vector<1x32xf32> to vector<8x32xf32>
    %157 = arith.mulf %155, %156 : vector<8x32xf32>
    %158 = vector.broadcast %137 : vector<1x32xf32> to vector<8x32xf32>
    %159 = arith.addf %157, %158 : vector<8x32xf32>
    %c1 = arith.constant 1 : index
    %c0_74 = arith.constant 0 : index
    %c0_75 = arith.constant 0 : index
    %c0_76 = arith.constant 0 : index
    %160 = vector.load %arg6[%c1, %c0_74, %c0_75, %c0_76] : memref<2x12x32x8xbf16, #tpu.memory_space<vmem>>, vector<1x12x32x8xbf16>
    %161 = vector.shape_cast %160 : vector<1x12x32x8xbf16> to vector<12x32x8xbf16>
    %c1_77 = arith.constant 1 : index
    %c0_78 = arith.constant 0 : index
    %c0_79 = arith.constant 0 : index
    %c0_80 = arith.constant 0 : index
    %162 = vector.load %arg7[%c1_77, %c0_78, %c0_79, %c0_80] : memref<2x12x1x8xf32, #tpu.memory_space<vmem>>, vector<1x12x1x8xf32>
    %163 = vector.shape_cast %162 : vector<1x12x1x8xf32> to vector<12x1x8xf32>
    %c1_81 = arith.constant 1 : index
    %c0_82 = arith.constant 0 : index
    %c0_83 = arith.constant 0 : index
    %c0_84 = arith.constant 0 : index
    %164 = vector.load %arg8[%c1_81, %c0_82, %c0_83, %c0_84] : memref<2x4x8x32xbf16, #tpu.memory_space<vmem>>, vector<1x4x8x32xbf16>
    %165 = vector.shape_cast %164 : vector<1x4x8x32xbf16> to vector<4x8x32xbf16>
    %166 = arith.truncf %159 : vector<8x32xf32> to vector<8x32xbf16>
    %167 = vector.shape_cast %166 : vector<8x32xbf16> to vector<1x8x32xbf16>
    %168 = vector.shape_cast %167 : vector<1x8x32xbf16> to vector<1x8x32xbf16>
    %169 = vector.broadcast %168 : vector<1x8x32xbf16> to vector<12x8x32xbf16>
    "tpu.trace_start"() <{level = 10 : i32, message = "bme,bed->bmd"}> : () -> ()
    %cst_85 = arith.constant dense<0.000000e+00> : vector<12x8x8xf32>
    %170 = tpu.matmul %169, %161, %cst_85 {dimension_numbers = #tpu.dot_dimension_numbers<[2], [1], [1], [2], [0, 0, 0, 1, 1, 2], [0], [0]>} : vector<12x8x32xbf16>, vector<12x32x8xbf16>, vector<12x8x8xf32> -> vector<12x8x8xf32>
    "tpu.trace_stop"() : () -> ()
    %171 = vector.broadcast %163 : vector<12x1x8xf32> to vector<12x8x8xf32>
    %172 = arith.addf %170, %171 : vector<12x8x8xf32>
    %173 = vector.extract_strided_slice %172 {offsets = [0, 0, 0], sizes = [4, 8, 8], strides = [1, 1, 1]} : vector<12x8x8xf32> to vector<4x8x8xf32>
    %174 = vector.extract_strided_slice %172 {offsets = [4, 0, 0], sizes = [4, 8, 8], strides = [1, 1, 1]} : vector<12x8x8xf32> to vector<4x8x8xf32>
    %175 = vector.extract_strided_slice %172 {offsets = [8, 0, 0], sizes = [4, 8, 8], strides = [1, 1, 1]} : vector<12x8x8xf32> to vector<4x8x8xf32>
    "tpu.trace_start"() <{level = 10 : i32, message = "bqd,bkd->bqk"}> : () -> ()
    %cst_86 = arith.constant dense<0.000000e+00> : vector<4x8x8xf32>
    %176 = tpu.matmul %173, %174, %cst_86 {dimension_numbers = #tpu.dot_dimension_numbers<[2], [2], [1], [1], [0, 0, 0, 1, 1, 1], [0], [0]>} : vector<4x8x8xf32>, vector<4x8x8xf32>, vector<4x8x8xf32> -> vector<4x8x8xf32>
    "tpu.trace_stop"() : () -> ()
    %cst_87 = arith.constant 0.353553385 : f32
    %177 = vector.broadcast %cst_87 : f32 to vector<4x8x8xf32>
    %178 = arith.mulf %176, %177 : vector<4x8x8xf32>
    %179 = arith.addf %178, %26 : vector<4x8x8xf32>
    %cst_88 = arith.constant dense<0xFF800000> : vector<4x8xf32>
    %180 = vector.multi_reduction <maximumf>, %179, %cst_88 [2] : vector<4x8x8xf32> to vector<4x8xf32>
    %181 = vector.shape_cast %180 : vector<4x8xf32> to vector<4x8x1xf32>
    %182 = vector.broadcast %181 : vector<4x8x1xf32> to vector<4x8x8xf32>
    %183 = arith.subf %179, %182 : vector<4x8x8xf32>
    %184 = math.exp %183 : vector<4x8x8xf32>
    %cst_89 = arith.constant dense<0.000000e+00> : vector<4x8xf32>
    %185 = vector.multi_reduction <add>, %184, %cst_89 [2] : vector<4x8x8xf32> to vector<4x8xf32>
    %186 = vector.shape_cast %185 : vector<4x8xf32> to vector<4x8x1xf32>
    %187 = vector.broadcast %186 : vector<4x8x1xf32> to vector<4x8x8xf32>
    %188 = arith.divf %184, %187 : vector<4x8x8xf32>
    "tpu.trace_start"() <{level = 10 : i32, message = "bqk,bkd->bqd"}> : () -> ()
    %cst_90 = arith.constant dense<0.000000e+00> : vector<4x8x8xf32>
    %189 = tpu.matmul %188, %175, %cst_90 {dimension_numbers = #tpu.dot_dimension_numbers<[2], [1], [1], [2], [0, 0, 0, 1, 1, 2], [0], [0]>} : vector<4x8x8xf32>, vector<4x8x8xf32>, vector<4x8x8xf32> -> vector<4x8x8xf32>
    "tpu.trace_stop"() : () -> ()
    %c1_91 = arith.constant 1 : index
    %c0_92 = arith.constant 0 : index
    %c0_93 = arith.constant 0 : index
    %190 = vector.load %arg9[%c1_91, %c0_92, %c0_93] : memref<2x1x32xf32, #tpu.memory_space<vmem>>, vector<1x1x32xf32>
    %191 = vector.shape_cast %190 : vector<1x1x32xf32> to vector<1x32xf32>
    %192 = vector.extract_strided_slice %189 {offsets = [0, 0, 0], sizes = [1, 8, 8], strides = [1, 1, 1]} : vector<4x8x8xf32> to vector<1x8x8xf32>
    %193 = vector.shape_cast %192 : vector<1x8x8xf32> to vector<8x8xf32>
    %194 = arith.truncf %193 : vector<8x8xf32> to vector<8x8xbf16>
    %195 = vector.extract_strided_slice %165 {offsets = [0, 0, 0], sizes = [1, 8, 32], strides = [1, 1, 1]} : vector<4x8x32xbf16> to vector<1x8x32xbf16>
    %196 = vector.shape_cast %195 : vector<1x8x32xbf16> to vector<8x32xbf16>
    %cst_94 = arith.constant dense<0.000000e+00> : vector<8x32xf32>
    %197 = tpu.matmul %194, %196, %cst_94 {dimension_numbers = #tpu.dot_dimension_numbers<[1], [0], [0], [1], [0, 0, 1, 1], [], []>} : vector<8x8xbf16>, vector<8x32xbf16>, vector<8x32xf32> -> vector<8x32xf32>
    %198 = vector.broadcast %191 : vector<1x32xf32> to vector<8x32xf32>
    %199 = arith.addf %198, %197 : vector<8x32xf32>
    %200 = vector.extract_strided_slice %189 {offsets = [1, 0, 0], sizes = [1, 8, 8], strides = [1, 1, 1]} : vector<4x8x8xf32> to vector<1x8x8xf32>
    %201 = vector.shape_cast %200 : vector<1x8x8xf32> to vector<8x8xf32>
    %202 = arith.truncf %201 : vector<8x8xf32> to vector<8x8xbf16>
    %203 = vector.extract_strided_slice %165 {offsets = [1, 0, 0], sizes = [1, 8, 32], strides = [1, 1, 1]} : vector<4x8x32xbf16> to vector<1x8x32xbf16>
    %204 = vector.shape_cast %203 : vector<1x8x32xbf16> to vector<8x32xbf16>
    %cst_95 = arith.constant dense<0.000000e+00> : vector<8x32xf32>
    %205 = tpu.matmul %202, %204, %cst_95 {dimension_numbers = #tpu.dot_dimension_numbers<[1], [0], [0], [1], [0, 0, 1, 1], [], []>} : vector<8x8xbf16>, vector<8x32xbf16>, vector<8x32xf32> -> vector<8x32xf32>
    %206 = arith.addf %199, %205 : vector<8x32xf32>
    %207 = vector.extract_strided_slice %189 {offsets = [2, 0, 0], sizes = [1, 8, 8], strides = [1, 1, 1]} : vector<4x8x8xf32> to vector<1x8x8xf32>
    %208 = vector.shape_cast %207 : vector<1x8x8xf32> to vector<8x8xf32>
    %209 = arith.truncf %208 : vector<8x8xf32> to vector<8x8xbf16>
    %210 = vector.extract_strided_slice %165 {offsets = [2, 0, 0], sizes = [1, 8, 32], strides = [1, 1, 1]} : vector<4x8x32xbf16> to vector<1x8x32xbf16>
    %211 = vector.shape_cast %210 : vector<1x8x32xbf16> to vector<8x32xbf16>
    %cst_96 = arith.constant dense<0.000000e+00> : vector<8x32xf32>
    %212 = tpu.matmul %209, %211, %cst_96 {dimension_numbers = #tpu.dot_dimension_numbers<[1], [0], [0], [1], [0, 0, 1, 1], [], []>} : vector<8x8xbf16>, vector<8x32xbf16>, vector<8x32xf32> -> vector<8x32xf32>
    %213 = arith.addf %206, %212 : vector<8x32xf32>
    %214 = vector.extract_strided_slice %189 {offsets = [3, 0, 0], sizes = [1, 8, 8], strides = [1, 1, 1]} : vector<4x8x8xf32> to vector<1x8x8xf32>
    %215 = vector.shape_cast %214 : vector<1x8x8xf32> to vector<8x8xf32>
    %216 = arith.truncf %215 : vector<8x8xf32> to vector<8x8xbf16>
    %217 = vector.extract_strided_slice %165 {offsets = [3, 0, 0], sizes = [1, 8, 32], strides = [1, 1, 1]} : vector<4x8x32xbf16> to vector<1x8x32xbf16>
    %218 = vector.shape_cast %217 : vector<1x8x32xbf16> to vector<8x32xbf16>
    %cst_97 = arith.constant dense<0.000000e+00> : vector<8x32xf32>
    %219 = tpu.matmul %216, %218, %cst_97 {dimension_numbers = #tpu.dot_dimension_numbers<[1], [0], [0], [1], [0, 0, 1, 1], [], []>} : vector<8x8xbf16>, vector<8x32xbf16>, vector<8x32xf32> -> vector<8x32xf32>
    %220 = arith.addf %213, %219 : vector<8x32xf32>
    %221 = arith.addf %159, %220 : vector<8x32xf32>
    %c1_98 = arith.constant 1 : index
    %c0_99 = arith.constant 0 : index
    %c0_100 = arith.constant 0 : index
    %222 = vector.load %arg14[%c1_98, %c0_99, %c0_100] : memref<2x1x32xf32, #tpu.memory_space<vmem>>, vector<1x1x32xf32>
    %223 = vector.shape_cast %222 : vector<1x1x32xf32> to vector<1x32xf32>
    %c1_101 = arith.constant 1 : index
    %c0_102 = arith.constant 0 : index
    %c0_103 = arith.constant 0 : index
    %224 = vector.load %arg15[%c1_101, %c0_102, %c0_103] : memref<2x1x32xf32, #tpu.memory_space<vmem>>, vector<1x1x32xf32>
    %225 = vector.shape_cast %224 : vector<1x1x32xf32> to vector<1x32xf32>
    %cst_104 = arith.constant dense<0.000000e+00> : vector<8xf32>
    %226 = vector.multi_reduction <add>, %221, %cst_104 [1] : vector<8x32xf32> to vector<8xf32>
    %227 = vector.shape_cast %226 : vector<8xf32> to vector<8x1xf32>
    %cst_105 = arith.constant 3.200000e+01 : f32
    %228 = vector.broadcast %cst_105 : f32 to vector<8x1xf32>
    %229 = arith.divf %227, %228 : vector<8x1xf32>
    %230 = vector.broadcast %229 : vector<8x1xf32> to vector<8x32xf32>
    %231 = arith.subf %221, %230 : vector<8x32xf32>
    %232 = arith.mulf %231, %231 : vector<8x32xf32>
    %cst_106 = arith.constant dense<0.000000e+00> : vector<8xf32>
    %233 = vector.multi_reduction <add>, %232, %cst_106 [1] : vector<8x32xf32> to vector<8xf32>
    %234 = vector.shape_cast %233 : vector<8xf32> to vector<8x1xf32>
    %cst_107 = arith.constant 3.200000e+01 : f32
    %235 = vector.broadcast %cst_107 : f32 to vector<8x1xf32>
    %236 = arith.divf %234, %235 : vector<8x1xf32>
    %237 = vector.broadcast %229 : vector<8x1xf32> to vector<8x32xf32>
    %238 = arith.subf %221, %237 : vector<8x32xf32>
    %cst_108 = arith.constant 9.99999974E-6 : f32
    %239 = vector.broadcast %cst_108 : f32 to vector<8x1xf32>
    %240 = arith.addf %236, %239 : vector<8x1xf32>
    %241 = math.rsqrt %240 : vector<8x1xf32>
    %242 = vector.broadcast %241 : vector<8x1xf32> to vector<8x32xf32>
    %243 = arith.mulf %238, %242 : vector<8x32xf32>
    %244 = vector.broadcast %223 : vector<1x32xf32> to vector<8x32xf32>
    %245 = arith.mulf %243, %244 : vector<8x32xf32>
    %246 = vector.broadcast %225 : vector<1x32xf32> to vector<8x32xf32>
    %247 = arith.addf %245, %246 : vector<8x32xf32>
    %c1_109 = arith.constant 1 : index
    %c0_110 = arith.constant 0 : index
    %c0_111 = arith.constant 0 : index
    %248 = vector.load %arg10[%c1_109, %c0_110, %c0_111] : memref<2x32x64xbf16, #tpu.memory_space<vmem>>, vector<1x32x64xbf16>
    %249 = vector.shape_cast %248 : vector<1x32x64xbf16> to vector<32x64xbf16>
    %250 = arith.truncf %247 : vector<8x32xf32> to vector<8x32xbf16>
    %cst_112 = arith.constant dense<0.000000e+00> : vector<8x64xf32>
    %251 = tpu.matmul %250, %249, %cst_112 {dimension_numbers = #tpu.dot_dimension_numbers<[1], [0], [0], [1], [0, 0, 1, 1], [], []>} : vector<8x32xbf16>, vector<32x64xbf16>, vector<8x64xf32> -> vector<8x64xf32>
    %c1_113 = arith.constant 1 : index
    %c0_114 = arith.constant 0 : index
    %c0_115 = arith.constant 0 : index
    %252 = vector.load %arg11[%c1_113, %c0_114, %c0_115] : memref<2x1x64xf32, #tpu.memory_space<vmem>>, vector<1x1x64xf32>
    %253 = vector.shape_cast %252 : vector<1x1x64xf32> to vector<1x64xf32>
    %254 = vector.broadcast %253 : vector<1x64xf32> to vector<8x64xf32>
    %255 = arith.addf %251, %254 : vector<8x64xf32>
    %cst_116 = arith.constant 0.000000e+00 : f32
    %256 = vector.broadcast %cst_116 : f32 to vector<8x64xf32>
    %257 = arith.maximumf %255, %256 : vector<8x64xf32>
    %c1_117 = arith.constant 1 : index
    %c0_118 = arith.constant 0 : index
    %c0_119 = arith.constant 0 : index
    %258 = vector.load %arg12[%c1_117, %c0_118, %c0_119] : memref<2x64x32xbf16, #tpu.memory_space<vmem>>, vector<1x64x32xbf16>
    %259 = vector.shape_cast %258 : vector<1x64x32xbf16> to vector<64x32xbf16>
    %260 = arith.truncf %257 : vector<8x64xf32> to vector<8x64xbf16>
    %cst_120 = arith.constant dense<0.000000e+00> : vector<8x32xf32>
    %261 = tpu.matmul %260, %259, %cst_120 {dimension_numbers = #tpu.dot_dimension_numbers<[1], [0], [0], [1], [0, 0, 1, 1], [], []>} : vector<8x64xbf16>, vector<64x32xbf16>, vector<8x32xf32> -> vector<8x32xf32>
    %c1_121 = arith.constant 1 : index
    %c0_122 = arith.constant 0 : index
    %c0_123 = arith.constant 0 : index
    %262 = vector.load %arg13[%c1_121, %c0_122, %c0_123] : memref<2x1x32xf32, #tpu.memory_space<vmem>>, vector<1x1x32xf32>
    %263 = vector.shape_cast %262 : vector<1x1x32xf32> to vector<1x32xf32>
    %264 = vector.broadcast %263 : vector<1x32xf32> to vector<8x32xf32>
    %265 = arith.addf %261, %264 : vector<8x32xf32>
    %266 = arith.addf %247, %265 : vector<8x32xf32>
    %c1_124 = arith.constant 1 : index
    %c0_125 = arith.constant 0 : index
    %c0_126 = arith.constant 0 : index
    %267 = vector.load %arg16[%c1_124, %c0_125, %c0_126] : memref<2x1x32xf32, #tpu.memory_space<vmem>>, vector<1x1x32xf32>
    %268 = vector.shape_cast %267 : vector<1x1x32xf32> to vector<1x32xf32>
    %c1_127 = arith.constant 1 : index
    %c0_128 = arith.constant 0 : index
    %c0_129 = arith.constant 0 : index
    %269 = vector.load %arg17[%c1_127, %c0_128, %c0_129] : memref<2x1x32xf32, #tpu.memory_space<vmem>>, vector<1x1x32xf32>
    %270 = vector.shape_cast %269 : vector<1x1x32xf32> to vector<1x32xf32>
    %cst_130 = arith.constant dense<0.000000e+00> : vector<8xf32>
    %271 = vector.multi_reduction <add>, %266, %cst_130 [1] : vector<8x32xf32> to vector<8xf32>
    %272 = vector.shape_cast %271 : vector<8xf32> to vector<8x1xf32>
    %cst_131 = arith.constant 3.200000e+01 : f32
    %273 = vector.broadcast %cst_131 : f32 to vector<8x1xf32>
    %274 = arith.divf %272, %273 : vector<8x1xf32>
    %275 = vector.broadcast %274 : vector<8x1xf32> to vector<8x32xf32>
    %276 = arith.subf %266, %275 : vector<8x32xf32>
    %277 = arith.mulf %276, %276 : vector<8x32xf32>
    %cst_132 = arith.constant dense<0.000000e+00> : vector<8xf32>
    %278 = vector.multi_reduction <add>, %277, %cst_132 [1] : vector<8x32xf32> to vector<8xf32>
    %279 = vector.shape_cast %278 : vector<8xf32> to vector<8x1xf32>
    %cst_133 = arith.constant 3.200000e+01 : f32
    %280 = vector.broadcast %cst_133 : f32 to vector<8x1xf32>
    %281 = arith.divf %279, %280 : vector<8x1xf32>
    %282 = vector.broadcast %274 : vector<8x1xf32> to vector<8x32xf32>
    %283 = arith.subf %266, %282 : vector<8x32xf32>
    %cst_134 = arith.constant 9.99999974E-6 : f32
    %284 = vector.broadcast %cst_134 : f32 to vector<8x1xf32>
    %285 = arith.addf %281, %284 : vector<8x1xf32>
    %286 = math.rsqrt %285 : vector<8x1xf32>
    %287 = vector.broadcast %286 : vector<8x1xf32> to vector<8x32xf32>
    %288 = arith.mulf %283, %287 : vector<8x32xf32>
    %289 = vector.broadcast %268 : vector<1x32xf32> to vector<8x32xf32>
    %290 = arith.mulf %288, %289 : vector<8x32xf32>
    %291 = vector.broadcast %270 : vector<1x32xf32> to vector<8x32xf32>
    %292 = arith.addf %290, %291 : vector<8x32xf32>
    %293 = vector.extract_strided_slice %292 {offsets = [0, 0], sizes = [1, 32], strides = [1, 1]} : vector<8x32xf32> to vector<1x32xf32>
    %294 = vector.extract_strided_slice %292 {offsets = [1, 0], sizes = [1, 32], strides = [1, 1]} : vector<8x32xf32> to vector<1x32xf32>
    %295 = vector.extract_strided_slice %292 {offsets = [2, 0], sizes = [1, 32], strides = [1, 1]} : vector<8x32xf32> to vector<1x32xf32>
    %296 = vector.extract_strided_slice %292 {offsets = [3, 0], sizes = [1, 32], strides = [1, 1]} : vector<8x32xf32> to vector<1x32xf32>
    %297 = vector.extract_strided_slice %292 {offsets = [4, 0], sizes = [1, 32], strides = [1, 1]} : vector<8x32xf32> to vector<1x32xf32>
    %298 = vector.extract_strided_slice %292 {offsets = [5, 0], sizes = [1, 32], strides = [1, 1]} : vector<8x32xf32> to vector<1x32xf32>
    %299 = vector.extract_strided_slice %292 {offsets = [6, 0], sizes = [1, 32], strides = [1, 1]} : vector<8x32xf32> to vector<1x32xf32>
    %300 = vector.extract_strided_slice %292 {offsets = [7, 0], sizes = [1, 32], strides = [1, 1]} : vector<8x32xf32> to vector<1x32xf32>
    %301 = tpu.concatenate %293, %294, %295, %296, %297, %298, %299, %300 in 1 : vector<1x32xf32>, vector<1x32xf32>, vector<1x32xf32>, vector<1x32xf32>, vector<1x32xf32>, vector<1x32xf32>, vector<1x32xf32>, vector<1x32xf32> -> vector<1x256xf32>
    %c0_135 = arith.constant 0 : index
    %c0_136 = arith.constant 0 : index
    %c0_137 = arith.constant 0 : index
    %302 = vector.load %arg18[%c0_135, %c0_136, %c0_137] : memref<1x1x256xf32, #tpu.memory_space<vmem>>, vector<1x1x256xf32>
    %303 = vector.shape_cast %302 : vector<1x1x256xf32> to vector<1x256xf32>
    %304 = vector.shape_cast %301 : vector<1x256xf32> to vector<1x1x256xf32>
    tpu.vector_store %arg18[%c0_135, %c0_136, %c0_137], %304 {strides = array<i32>} : memref<1x1x256xf32, #tpu.memory_space<vmem>>, vector<1x1x256xf32>,
    return
  }
  func.func @transform_0(%arg0: i32) -> (i32, i32, i32) {
    %c0_i32 = arith.constant 0 : i32
    %c0_i32_0 = arith.constant 0 : i32
    %c0_i32_1 = arith.constant 0 : i32
    return %arg0, %c0_i32, %c0_i32_0 : i32, i32, i32
  }
  func.func @transform_1(%arg0: i32) -> (i32, i32) {
    %c0_i32 = arith.constant 0 : i32
    %c0_i32_0 = arith.constant 0 : i32
    %c0_i32_1 = arith.constant 0 : i32
    return %c0_i32, %c0_i32_0 : i32, i32
  }
  func.func @transform_2(%arg0: i32) -> (i32, i32) {
    %c0_i32 = arith.constant 0 : i32
    %c0_i32_0 = arith.constant 0 : i32
    %c0_i32_1 = arith.constant 0 : i32
    return %c0_i32, %c0_i32_0 : i32, i32
  }
  func.func @transform_3(%arg0: i32) -> (i32, i32) {
    %c0_i32 = arith.constant 0 : i32
    %c0_i32_0 = arith.constant 0 : i32
    %c0_i32_1 = arith.constant 0 : i32
    return %c0_i32, %c0_i32_0 : i32, i32
  }
  func.func @transform_4(%arg0: i32) -> (i32, i32, i32) {
    %c0_i32 = arith.constant 0 : i32
    %c0_i32_0 = arith.constant 0 : i32
    %c0_i32_1 = arith.constant 0 : i32
    return %arg0, %c0_i32, %c0_i32_0 : i32, i32, i32
  }
  func.func @transform_5(%arg0: i32) -> (i32, i32, i32, i32) {
    %c0_i32 = arith.constant 0 : i32
    %c0_i32_0 = arith.constant 0 : i32
    %c0_i32_1 = arith.constant 0 : i32
    %c0_i32_2 = arith.constant 0 : i32
    %c0_i32_3 = arith.constant 0 : i32
    return %c0_i32, %c0_i32_0, %c0_i32_1, %c0_i32_2 : i32, i32, i32, i32
  }
  func.func @transform_6(%arg0: i32) -> (i32, i32, i32, i32) {
    %c0_i32 = arith.constant 0 : i32
    %c0_i32_0 = arith.constant 0 : i32
    %c0_i32_1 = arith.constant 0 : i32
    %c0_i32_2 = arith.constant 0 : i32
    %c0_i32_3 = arith.constant 0 : i32
    return %c0_i32, %c0_i32_0, %c0_i32_1, %c0_i32_2 : i32, i32, i32, i32
  }
  func.func @transform_7(%arg0: i32) -> (i32, i32, i32, i32) {
    %c0_i32 = arith.constant 0 : i32
    %c0_i32_0 = arith.constant 0 : i32
    %c0_i32_1 = arith.constant 0 : i32
    %c0_i32_2 = arith.constant 0 : i32
    %c0_i32_3 = arith.constant 0 : i32
    return %c0_i32, %c0_i32_0, %c0_i32_1, %c0_i32_2 : i32, i32, i32, i32
  }
  func.func @transform_8(%arg0: i32) -> (i32, i32, i32) {
    %c0_i32 = arith.constant 0 : i32
    %c0_i32_0 = arith.constant 0 : i32
    %c0_i32_1 = arith.constant 0 : i32
    %c0_i32_2 = arith.constant 0 : i32
    return %c0_i32, %c0_i32_0, %c0_i32_1 : i32, i32, i32
  }
  func.func @transform_9(%arg0: i32) -> (i32, i32, i32) {
    %c0_i32 = arith.constant 0 : i32
    %c0_i32_0 = arith.constant 0 : i32
    %c0_i32_1 = arith.constant 0 : i32
    %c0_i32_2 = arith.constant 0 : i32
    return %c0_i32, %c0_i32_0, %c0_i32_1 : i32, i32, i32
  }
  func.func @transform_10(%arg0: i32) -> (i32, i32, i32) {
    %c0_i32 = arith.constant 0 : i32
    %c0_i32_0 = arith.constant 0 : i32
    %c0_i32_1 = arith.constant 0 : i32
    %c0_i32_2 = arith.constant 0 : i32
    return %c0_i32, %c0_i32_0, %c0_i32_1 : i32, i32, i32
  }
  func.func @transform_11(%arg0: i32) -> (i32, i32, i32) {
    %c0_i32 = arith.constant 0 : i32
    %c0_i32_0 = arith.constant 0 : i32
    %c0_i32_1 = arith.constant 0 : i32
    %c0_i32_2 = arith.constant 0 : i32
    return %c0_i32, %c0_i32_0, %c0_i32_1 : i32, i32, i32
  }
  func.func @transform_12(%arg0: i32) -> (i32, i32, i32) {
    %c0_i32 = arith.constant 0 : i32
    %c0_i32_0 = arith.constant 0 : i32
    %c0_i32_1 = arith.constant 0 : i32
    %c0_i32_2 = arith.constant 0 : i32
    return %c0_i32, %c0_i32_0, %c0_i32_1 : i32, i32, i32
  }
  func.func @transform_13(%arg0: i32) -> (i32, i32, i32) {
    %c0_i32 = arith.constant 0 : i32
    %c0_i32_0 = arith.constant 0 : i32
    %c0_i32_1 = arith.constant 0 : i32
    %c0_i32_2 = arith.constant 0 : i32
    return %c0_i32, %c0_i32_0, %c0_i32_1 : i32, i32, i32
  }
  func.func @transform_14(%arg0: i32) -> (i32, i32, i32) {
    %c0_i32 = arith.constant 0 : i32
    %c0_i32_0 = arith.constant 0 : i32
    %c0_i32_1 = arith.constant 0 : i32
    %c0_i32_2 = arith.constant 0 : i32
    return %c0_i32, %c0_i32_0, %c0_i32_1 : i32, i32, i32
  }
  func.func @transform_15(%arg0: i32) -> (i32, i32, i32) {
    %c0_i32 = arith.constant 0 : i32
    %c0_i32_0 = arith.constant 0 : i32
    %c0_i32_1 = arith.constant 0 : i32
    %c0_i32_2 = arith.constant 0 : i32
    return %c0_i32, %c0_i32_0, %c0_i32_1 : i32, i32, i32
  }
  func.func @transform_16(%arg0: i32) -> (i32, i32, i32) {
    %c0_i32 = arith.constant 0 : i32
    %c0_i32_0 = arith.constant 0 : i32
    %c0_i32_1 = arith.constant 0 : i32
    %c0_i32_2 = arith.constant 0 : i32
    return %c0_i32, %c0_i32_0, %c0_i32_1 : i32, i32, i32
  }
  func.func @transform_17(%arg0: i32) -> (i32, i32, i32) {
    %c0_i32 = arith.constant 0 : i32
    %c0_i32_0 = arith.constant 0 : i32
    %c0_i32_1 = arith.constant 0 : i32
    return %arg0, %c0_i32, %c0_i32_0 : i32, i32, i32
  }
}

</mosaic_0001>

<bundles_post_ra>
// kernel: senti_transformer_forward.1
= control target key start
LH: loop header
LB: loop body
LE: loop exit
PB: predicated region body
PF: predicated region fallthrough
CT: control target
= control target key end

     0   :  { %s5405_s24 = smov 0   ;;  %s6113_s0 = inlined_call_operand.vmem [shape: s32[2,8,1], index: 0, kind: input, shape index: {}]   ;;  %s6114_s1 = inlined_call_operand.vmem [shape: bf16[32,32], index: 1, kind: input, shape index: {}]   ;;  %s6115_s2 = inlined_call_operand.vmem [shape: f32[8,32], index: 2, kind: input, shape index: {}]   ;;  %s6116_s3 = inlined_call_operand.vmem [shape: f32[8,8], index: 3, kind: input, shape index: {}]   ;;  %s6117_s4 = inlined_call_operand.vmem [shape: f32[2,1,8], index: 4, kind: input, shape index: {}]   ;;  %s6118_s5 = inlined_call_operand.vmem [shape: bf16[2,12,32,8], index: 5, kind: input, shape index: {}]   ;;  %s6119_s6 = inlined_call_operand.vmem [shape: f32[2,12,1,8], index: 6, kind: input, shape index: {}]   ;;  %s6120_s7 = inlined_call_operand.vmem [shape: bf16[2,4,8,32], index: 7, kind: input, shape index: {}]   ;;  %s6121_s8 = inlined_call_operand.vmem [shape: f32[2,1,32], index: 8, kind: input, shape index: {}]   ;;  %s6122_s9 = inlined_call_operand.vmem [shape: bf16[2,32,64], index: 9, kind: input, shape index: {}]   ;;  %s6123_s10 = inlined_call_operand.vmem [shape: f32[2,1,64], index: 10, kind: input, shape index: {}]   ;;  %s6124_s11 = inlined_call_operand.vmem [shape: bf16[2,64,32], index: 11, kind: input, shape index: {}]   ;;  %s6125_s12 = inlined_call_operand.vmem [shape: f32[2,1,32], index: 12, kind: input, shape index: {}]   ;;  %s6126_s13 = inlined_call_operand.vmem [shape: f32[2,1,32], index: 13, kind: input, shape index: {}]   ;;  %s6127_s14 = inlined_call_operand.vmem [shape: f32[2,1,32], index: 14, kind: input, shape index: {}]   ;;  %s6128_s15 = inlined_call_operand.vmem [shape: f32[2,1,32], index: 15, kind: input, shape index: {}]   ;;  %s6129_s16 = inlined_call_operand.vmem [shape: f32[2,1,32], index: 16, kind: input, shape index: {}]   ;;  %s6130_s17 = inlined_call_operand.vmem [shape: f32[2,1,256], index: 17, kind: output, shape index: {}]  }
   0x1   :  { %6132 = sst [smem:[#allocation2_spill]] %s6113_s0 }
   0x2   :  { %6133 = sst [smem:[#allocation3_spill]] %s6114_s1 }
   0x3 LB: > { %s4420_s25 = sadd.s32 4294967295, %s5306_s24   ;;  %p4424_p0 = scmp.ge.s32.totalorder %s5306_s24, 1  ;;  %s5306_s24 = sphi %s5405_s24, %s27_s24  }
   0x4   : > { %p494_p1 = scmp.lt.s32.totalorder %s5306_s24, 3 }
   0x6   : > { %p495_p2 = pnand %p4424_p0, %p494_p1 }
   0x7   : > { %p547_p3 = scmp.lt.s32.totalorder (!%p495_p2), %s4420_s25, 1  ;;  %v5308_v0 = vmov (!%p495_p2), 0   ;;  %v5309_v1 = vmov (!%p495_p2), 0.0   ;;  %s6134_s28 = sld [smem:[#allocation3_spill]] (!%p495_p2)  ;;  %vm5310_vm0 = vmmov (!%p495_p2), 0   ;;  %v560_v5 = vlaneseq (!%p495_p2)  ;;  %v5200_v10 = vld [vmem:[%s6118_s5] sm:$0xff] (!%p495_p2)  }
   0x8   : > { %498 = sbr.rel (%p495_p2) target bundleno = 5042 (0x13b2), region = 88  ;;  %5197 = vset.pattern.permute.xlu0 (!%p495_p2), %v5308_v0  ;;  %4814 = vmatprep.subr.bf16.mxu0 (!%p495_p2), %v5309_v1  ;;  %s6135_s18 = sld [smem:[#allocation2_spill]] (!%p495_p2)  ;;  %vm585_vm2 = vcmask (!%p495_p2), 261120   ;;  %v5201_v11 = vld [vmem:[%s6118_s5 + $0x10] sm:$0xff] (!%p495_p2)   ;;  %v5202_v12 = vld [vmem:[%s6118_s5 + $0x8] sm:$0xff] (!%p495_p2)   ;;  %v5203_v13 = vld [vmem:[%s6118_s5 + $0x18] sm:$0xff] (!%p495_p2)  }
   0x9   : > { %4822 = vmatprep.subr.bf16.mxu1 (!%p495_p2), %v5309_v1  ;;  %4818 = vmatprep.mubr.msk.bf16.mxu0 (!%p495_p2), %vm5310_vm0, %v5309_v1  ;;  %v561_v6 = vand.u32 (!%p495_p2), 127, %v560_v5  ;;  %v629_v15 = vld [vmem:[%s6115_s2] sm:$0xff] (!%p495_p2)  ;;  %v5205_v22 = vld [vmem:[%s6118_s5 + $0x30] sm:$0xff] (!%p495_p2)   ;;  %v5206_v24 = vld [vmem:[%s6118_s5 + $0x28] sm:$0xff] (!%p495_p2)   ;;  %vm1405_vm3 = vcmask (!%p495_p2), 64512   ;;  %vm2059_vm4 = vcmask (!%p495_p2), 1043456  }
   0xa   : > { %4826 = vmatprep.mubr.msk.bf16.mxu1 (!%p495_p2), %vm5310_vm0, %v5309_v1  ;;  %4823 = vmatpush3.bf16.msra.mxu1 (!%p495_p2), %v5200_v10  ;;  %v5204_v21 = vld [vmem:[%s6118_s5 + $0x20] sm:$0xff] (!%p495_p2)   ;;  %v5207_v25 = vld [vmem:[%s6118_s5 + $0x38] sm:$0xff] (!%p495_p2)   ;;  %v5209_v27 = vld [vmem:[%s6118_s5 + $0x50] sm:$0xff] (!%p495_p2)   ;;  %vm2393_vm5 = vcmask (!%p495_p2), 523264   ;;  %s5311_s26 = smov (!%p495_p2), 32   ;;  %s5312_s27 = smov (!%p495_p2), 64  }
   0xb   : > { %4824 = vmatprep.subr.bf16.mxu1 (!%p495_p2), %v5309_v1  ;;  %v5208_v26 = vld [vmem:[%s6118_s5 + $0x40] sm:$0xff] (!%p495_p2)   ;;  %v5210_v28 = vld [vmem:[%s6118_s5 + $0x48] sm:$0xff] (!%p495_p2)   ;;  %v5211_v29 = vld [vmem:[%s6118_s5 + $0x58] sm:$0xff] (!%p495_p2)   ;;  %vm4330_vm6 = vcmask (!%p495_p2), 785408   ;;  %vm4355_vm7 = vcmp.lt.s32.totalorder (!%p495_p2), %v560_v5, 256 }
   0xc   : > { %v5212_v30 = vld [vmem:[%s6118_s5 + $0x60] sm:$0xff] (!%p495_p2)   ;;  %v5213_v31 = vld [vmem:[%s6118_s5 + $0x70] sm:$0xff] (!%p495_p2)   ;;  %v5214_v32 = vld [vmem:[%s6118_s5 + $0x68] sm:$0xff] (!%p495_p2)  }
   0xd   : > { %v5198_v2 = vld [vmem:[%s6134_s28] sm:$0xff] (!%p495_p2)   ;;  %v5199_v4 = vld [vmem:[%s6134_s28 + $0x8] sm:$0xff] (!%p495_p2)   ;;  %v5215_v33 = vld [vmem:[%s6118_s5 + $0x78] sm:$0xff] (!%p495_p2)  }
   0xe   : > { %4815 = vmatpush3.bf16.msra.mxu0 (!%p495_p2), %v5198_v2  ;;  %4825 = vmatpush3.bf16.msra.mxu1 (!%p495_p2), %v5202_v12  ;;  %v5216_v34 = vld [vmem:[%s6118_s5 + $0x80] sm:$0xff] (!%p495_p2)   ;;  %v5217_v35 = vld [vmem:[%s6118_s5 + $0x90] sm:$0xff] (!%p495_p2)   ;;  %v5218_v36 = vld [vmem:[%s6118_s5 + $0x88] sm:$0xff] (!%p495_p2)  }
   0xf   : > { %s6137_s25 = smov (!%p547_p3, %s4420_s25), 1  ;;  %4816 = vmatprep.subr.bf16.mxu0 %v5309_v1  ;;  %4838 = vmatprep.subr.bf16.mxu1 %v5309_v1  ;;  %v5219_v37 = vld [vmem:[%s6118_s5 + $0x98] sm:$0xff]   ;;  %v5220_v38 = vld [vmem:[%s6118_s5 + $0xa0] sm:$0xff]   ;;  %v5221_v39 = vld [vmem:[%s6118_s5 + $0xb0] sm:$0xff]  }
  0x10   : > { %s4425_s29 = sshll.u32 %s6137_s25, 3  ;;  %v5222_v40 = vld [vmem:[%s6118_s5 + $0xa8] sm:$0xff]   ;;  %v5223_v41 = vld [vmem:[%s6118_s5 + $0xb8] sm:$0xff]   ;;  %v4436_v58 = vld [vmem:[%s6119_s6 + $0x4] ss:$0 sm:$0xff]  ;;  %s553_s21 = scalar_lea.vmem %s6117_s4, %s6137_s25 }
  0x11   : > { %s550_s19 = scalar_lea.vmem %s6135_s18, %s4425_s29  ;;  %v4437_v59 = vld [vmem:[%s6119_s6 + $0x5] ss:$0 sm:$0xff]  ;;  %v4432_v62 = vld [vmem:[%s6119_s6] ss:$0 sm:$0xff]  ;;  %v4433_v63 = vld [vmem:[%s6119_s6 + $0x1] ss:$0 sm:$0xff] }
  0x12   : > { %v559_v3 = vld [vmem:[%s550_s19] sm:$0xff]  ;;  %4817 = vmatpush3.bf16.msra.mxu0 %v5199_v4  ;;  %s5313_s29 = smov 96   ;;  %s4426_s0 = sshll.u32 %s6137_s25, 1 }
  0x13   : > { %563 = vperm.xlu0 %5197, %v559_v3   ;;  %4830 = vmatprep.subr.bf16.mxu0 %v5309_v1  ;;  %v4438_v12 = vld [vmem:[%s6119_s6 + $0x6] ss:$0 sm:$0xff]  ;;  %s557_s19 = scalar_lea.vmem %s6130_s17, %s4426_s0 }
  0x92   : > { %v564_v7 = vpop.permute.xlu0 %563 }
  0x93   : > { %vm565_vm1 = vcmp.eq.s32.totalorder %v564_v7, %v561_v6 }
  0x94   : > { %v4427_v8 = vsel %vm565_vm1, 1.0, %v5309_v1 }
  0x95   : > { %v568_v9 = vpack.c.bf16 %v4427_v8, %v4427_v8 }
  0x97   : > { %4819 = vmatmul.mubr.msk.bf16.vlgmr.msra.gmra.mrb[0].mxu0 %vm585_vm2, %v568_v9 }
  0x98   : > { %4834 = vmatprep.mubr.msk.bf16.mxu0 %vm5310_vm0, %v5309_v1  ;;  %4831 = vmatpush3.bf16.msra.mxu0 %v5201_v11 }
  0x99   : > { %4832 = vmatprep.subr.bf16.mxu0 %v5309_v1 }
  0x9c   : > { %4833 = vmatpush3.bf16.msra.mxu0 %v5203_v13  ;;  %v4439_v13 = vld [vmem:[%s6119_s6 + $0x7] ss:$0 sm:$0xff] }
  0x9d   : > { %4846 = vmatprep.subr.bf16.mxu0 %v5309_v1 }
 0x16a   : > { %v623_v14 = vpop.f32.mrb[0].mxu0 }
 0x16b   : > { %v630_v16 = vmul.f32 5.656854, %v623_v14  ;;  %v4820_v17 = vpop.f32.mrb[1].mxu0 }
 0x16c   : > { %v626_v18 = vpop.f32.mrb[2].mxu0  ;;  %v4435_v17 = vld [vmem:[%s6119_s6 + $0x3] ss:$0 sm:$0xff] }
 0x16d   : > { %v5457_v19 = vadd.f32 %v630_v16, %v629_v15  ;;  %v4821_v20 = vpop.f32.mrb[3].mxu0  ;;  %v4434_v16 = vld [vmem:[%s6119_s6 + $0x2] ss:$0 sm:$0xff] }
 0x16f   : > { %v5467_v23 = vpack.c.bf16 %v5457_v19, %v5457_v19 }
 0x171   : > { %4827 = vmatmul.mubr.msk.bf16.vlgmr.msra.gmra.mrb[0].mxu1 %vm585_vm2, %v5467_v23  ;;  %4835 = vmatmul.mubr.msk.bf16.vlgmr.msra.gmra.mrb[4].mxu0 %vm585_vm2, %v5467_v23 }
 0x172   : > { %4839 = vmatpush3.bf16.msra.mxu1 %v5204_v21  ;;  %4847 = vmatpush3.bf16.msra.mxu0 %v5205_v22 }
 0x173   : > { %4840 = vmatprep.subr.bf16.mxu1 %v5309_v1  ;;  %4848 = vmatprep.subr.bf16.mxu0 %v5309_v1 }
 0x174   : > { %4842 = vmatprep.mubr.msk.bf16.mxu1 %vm5310_vm0, %v5309_v1  ;;  %4850 = vmatprep.mubr.msk.bf16.mxu0 %vm5310_vm0, %v5309_v1 }
 0x176   : > { %4841 = vmatpush3.bf16.msra.mxu1 %v5206_v24  ;;  %4849 = vmatpush3.bf16.msra.mxu0 %v5207_v25 }
 0x177   : > { %4854 = vmatprep.subr.bf16.mxu1 %v5309_v1  ;;  %4862 = vmatprep.subr.bf16.mxu0 %v5309_v1 }
 0x179   : > { %4843 = vmatmul.mubr.msk.bf16.vlgmr.msra.gmra.mrb[4].mxu1 %vm585_vm2, %v5467_v23  ;;  %4851 = vmatmul.mubr.msk.bf16.vlgmr.msra.gmra.mrb[8].mxu0 %vm585_vm2, %v5467_v23 }
 0x17a   : > { %4855 = vmatpush3.bf16.msra.mxu1 %v5208_v26  ;;  %4863 = vmatpush3.bf16.msra.mxu0 %v5209_v27 }
 0x17b   : > { %4856 = vmatprep.subr.bf16.mxu1 %v5309_v1  ;;  %4864 = vmatprep.subr.bf16.mxu0 %v5309_v1 }
 0x17c   : > { %4858 = vmatprep.mubr.msk.bf16.mxu1 %vm5310_vm0, %v5309_v1  ;;  %4866 = vmatprep.mubr.msk.bf16.mxu0 %vm5310_vm0, %v5309_v1 }
 0x17e   : > { %4857 = vmatpush3.bf16.msra.mxu1 %v5210_v28  ;;  %4865 = vmatpush3.bf16.msra.mxu0 %v5211_v29  ;;  %v4440_v29 = vld [vmem:[%s6119_s6 + $0x8] ss:$0 sm:$0xff] }
 0x17f   : > { %4870 = vmatprep.subr.bf16.mxu1 %v5309_v1  ;;  %4878 = vmatprep.subr.bf16.mxu0 %v5309_v1 }
 0x181   : > { %4859 = vmatmul.mubr.msk.bf16.vlgmr.msra.gmra.mrb[8].mxu1 %vm585_vm2, %v5467_v23  ;;  %4867 = vmatmul.mubr.msk.bf16.vlgmr.msra.gmra.mrb[12].mxu0 %vm585_vm2, %v5467_v23 }
 0x182   : > { %4871 = vmatpush3.bf16.msra.mxu1 %v5212_v30  ;;  %4879 = vmatpush3.bf16.msra.mxu0 %v5213_v31  ;;  %v4441_v30 = vld [vmem:[%s6119_s6 + $0x9] ss:$0 sm:$0xff] }
 0x183   : > { %4872 = vmatprep.subr.bf16.mxu1 %v5309_v1  ;;  %4880 = vmatprep.subr.bf16.mxu0 %v5309_v1 }
 0x184   : > { %4874 = vmatprep.mubr.msk.bf16.mxu1 %vm5310_vm0, %v5309_v1  ;;  %4882 = vmatprep.mubr.msk.bf16.mxu0 %vm5310_vm0, %v5309_v1 }
 0x186   : > { %4873 = vmatpush3.bf16.msra.mxu1 %v5214_v32  ;;  %4881 = vmatpush3.bf16.msra.mxu0 %v5215_v33 }
 0x187   : > { %4886 = vmatprep.subr.bf16.mxu1 %v5309_v1  ;;  %4894 = vmatprep.subr.bf16.mxu0 %v5309_v1 }
 0x189   : > { %4875 = vmatmul.mubr.msk.bf16.vlgmr.msra.gmra.mrb[12].mxu1 %vm585_vm2, %v5467_v23  ;;  %4883 = vmatmul.mubr.msk.bf16.vlgmr.msra.gmra.mrb[16].mxu0 %vm585_vm2, %v5467_v23 }
 0x18a   : > { %4887 = vmatpush3.bf16.msra.mxu1 %v5216_v34  ;;  %4895 = vmatpush3.bf16.msra.mxu0 %v5217_v35 }
 0x18b   : > { %4888 = vmatprep.subr.bf16.mxu1 %v5309_v1  ;;  %4896 = vmatprep.subr.bf16.mxu0 %v5309_v1 }
 0x18c   : > { %4890 = vmatprep.mubr.msk.bf16.mxu1 %vm5310_vm0, %v5309_v1  ;;  %4898 = vmatprep.mubr.msk.bf16.mxu0 %vm5310_vm0, %v5309_v1 }
 0x18e   : > { %4889 = vmatpush3.bf16.msra.mxu1 %v5218_v36  ;;  %4897 = vmatpush3.bf16.msra.mxu0 %v5219_v37 }
 0x18f   : > { %4902 = vmatprep.subr.bf16.mxu1 %v5309_v1  ;;  %4910 = vmatprep.subr.bf16.mxu0 %v5309_v1 }
 0x191   : > { %4891 = vmatmul.mubr.msk.bf16.vlgmr.msra.gmra.mrb[16].mxu1 %vm585_vm2, %v5467_v23  ;;  %4899 = vmatmul.mubr.msk.bf16.vlgmr.msra.gmra.mrb[20].mxu0 %vm585_vm2, %v5467_v23 }
 0x192   : > { %4903 = vmatpush3.bf16.msra.mxu1 %v5220_v38  ;;  %4911 = vmatpush3.bf16.msra.mxu0 %v5221_v39 }
 0x193   : > { %4904 = vmatprep.subr.bf16.mxu1 %v5309_v1  ;;  %4912 = vmatprep.subr.bf16.mxu0 %v5309_v1 }
 0x194   : > { %4906 = vmatprep.mubr.msk.bf16.mxu1 %vm5310_vm0, %v5309_v1  ;;  %4914 = vmatprep.mubr.msk.bf16.mxu0 %vm5310_vm0, %v5309_v1 }
 0x196   : > { %4905 = vmatpush3.bf16.msra.mxu1 %v5222_v40  ;;  %4913 = vmatpush3.bf16.msra.mxu0 %v5223_v41 }
 0x197   : > { %4918 = vmatprep.subr.mxu0 %v5309_v1  ;;  %4923 = vmatprep.subr.mxu1 %v5309_v1 }
 0x199   : > { %4907 = vmatmul.mubr.msk.bf16.vlgmr.msra.gmra.mrb[20].mxu1 %vm585_vm2, %v5467_v23  ;;  %4915 = vmatmul.mubr.msk.bf16.vlgmr.msra.gmra.mrb[24].mxu0 %vm585_vm2, %v5467_v23 }
 0x19a   : > { %4920 = vmatprep.mubr.msk.f32.mxu0 %vm5310_vm0, %v5309_v1  ;;  %4925 = vmatprep.mubr.msk.f32.mxu1 %vm5310_vm0, %v5309_v1 }
 0x244   : > { %v827_v42 = vpop.f32.mrb[0].mxu1  ;;  %v879_v43 = vpop.f32.mrb[4].mxu0 }
 0x245   : > { %v4828_v44 = vpop.f32.mrb[1].mxu1  ;;  %v4836_v45 = vpop.f32.mrb[5].mxu0  ;;  %v828_v10 = vadd.f32 %v4432_v62, %v827_v42  ;;  %v880_v11 = vadd.f32 %v4433_v63, %v879_v43 }
 0x246   : > { %v830_v46 = vpop.f32.mrb[2].mxu1  ;;  %v882_v47 = vpop.f32.mrb[6].mxu0 }
 0x247   : > { %v4829_v48 = vpop.f32.mrb[3].mxu1  ;;  %v4837_v49 = vpop.f32.mrb[7].mxu0 }
 0x248   : > { %v632_v49 = vld [vmem:[%s6116_s3] sm:$0xff] }
 0x24c   : > { %v931_v50 = vpop.f32.mrb[4].mxu1  ;;  %v983_v51 = vpop.f32.mrb[8].mxu0 }
 0x24d   : > { %v4844_v52 = vpop.f32.mrb[5].mxu1  ;;  %v4852_v53 = vpop.f32.mrb[9].mxu0  ;;  %v932_v27 = vadd.f32 %v4434_v16, %v931_v50  ;;  %v984_v28 = vadd.f32 %v4435_v17, %v983_v51  ;;  %v4431_v50 = vld [vmem:[%s553_s21] ss:$0 sm:$0xff] }
 0x24e   : > { %v934_v54 = vpop.f32.mrb[6].mxu1  ;;  %v986_v55 = vpop.f32.mrb[10].mxu0  ;;  %v5654_v51 = vadd.f32 %v4431_v50, %v632_v49  ;;  %v702_v49 = vld [vmem:[%s6120_s7 + $0x4] sm:$0xf] }
 0x24f   : > { %v4845_v56 = vpop.f32.mrb[7].mxu1  ;;  %v4853_v57 = vpop.f32.mrb[11].mxu0  ;;  %v2115_v50 = vsel %vm2059_vm4, %v702_v49, 0  ;;  %v5229_v49 = vld [vmem:[%s6124_s11 + $0x18] sm:$0xff]  }
 0x254   : > { %v1035_v60 = vpop.f32.mrb[8].mxu1  ;;  %v1087_v61 = vpop.f32.mrb[12].mxu0 }
 0x255   : > { %v1036_v0 = vadd.f32 %v4436_v58, %v1035_v60  ;;  %v1088_v2 = vadd.f32 %v4437_v59, %v1087_v61  ;;  %v4860_v3 = vpop.f32.mrb[9].mxu1  ;;  %v4868_v4 = vpop.f32.mrb[13].mxu0 }
 0x256   : > { %v1038_v6 = vpop.f32.mrb[10].mxu1  ;;  %v1090_v7 = vpop.f32.mrb[14].mxu0 }
 0x257   : > { %v4861_v8 = vpop.f32.mrb[11].mxu1  ;;  %v4869_v9 = vpop.f32.mrb[15].mxu0  ;;  %4919 = vmatpush3.xpose.msk.msra.mxu0 %vm1405_vm3, %v1036_v0  ;;  %4924 = vmatpush3.xpose.msk.msra.mxu1 %vm1405_vm3, %v1088_v2 }
 0x258   : > { %4928 = vmatprep.subr.mxu0 %v5309_v1  ;;  %4933 = vmatprep.subr.mxu1 %v5309_v1 }
 0x25a   : > { %4921 = vmatmul.mubr.msk.f32.vlgmr.msra.gmra.mrb[28].mxu0 %vm1405_vm3, %v828_v10  ;;  %4926 = vmatmul.mubr.msk.f32.vlgmr.msra.gmra.mrb[24].mxu1 %vm1405_vm3, %v880_v11 }
 0x25b   : > { %4930 = vmatprep.mubr.msk.f32.mxu0 %vm5310_vm0, %v5309_v1  ;;  %4935 = vmatprep.mubr.msk.f32.mxu1 %vm5310_vm0, %v5309_v1 }
 0x25c   : > { %v1139_v14 = vpop.f32.mrb[12].mxu1  ;;  %v1191_v15 = vpop.f32.mrb[16].mxu0 }
 0x25d   : > { %v1140_v18 = vadd.f32 %v4438_v12, %v1139_v14  ;;  %v1192_v20 = vadd.f32 %v4439_v13, %v1191_v15  ;;  %v4876_v21 = vpop.f32.mrb[13].mxu1  ;;  %v4884_v22 = vpop.f32.mrb[17].mxu0 }
 0x25e   : > { %v1142_v23 = vpop.f32.mrb[14].mxu1  ;;  %v1194_v24 = vpop.f32.mrb[18].mxu0 }
 0x25f   : > { %v4877_v25 = vpop.f32.mrb[15].mxu1  ;;  %v4885_v26 = vpop.f32.mrb[19].mxu0  ;;  %4929 = vmatpush3.xpose.msk.msra.mxu0 %vm1405_vm3, %v1140_v18  ;;  %4934 = vmatpush3.xpose.msk.msra.mxu1 %vm1405_vm3, %v1192_v20 }
 0x260   : > { %4938 = vmatprep.subr.mxu0 %v5309_v1  ;;  %4943 = vmatprep.subr.mxu1 %v5309_v1 }
 0x262   : > { %4931 = vmatmul.mubr.msk.f32.vlgmr.msra.gmra.mrb[30].mxu0 %vm1405_vm3, %v932_v27  ;;  %4936 = vmatmul.mubr.msk.f32.vlgmr.msra.gmra.mrb[26].mxu1 %vm1405_vm3, %v984_v28 }
 0x263   : > { %4940 = vmatprep.mubr.msk.f32.mxu0 %vm5310_vm0, %v5309_v1  ;;  %4945 = vmatprep.mubr.msk.f32.mxu1 %vm5310_vm0, %v5309_v1 }
 0x264   : > { %v1243_v31 = vpop.f32.mrb[16].mxu1  ;;  %v1295_v32 = vpop.f32.mrb[20].mxu0 }
 0x265   : > { %v1244_v33 = vadd.f32 %v4440_v29, %v1243_v31  ;;  %v1296_v34 = vadd.f32 %v4441_v30, %v1295_v32  ;;  %v4892_v35 = vpop.f32.mrb[17].mxu1  ;;  %v4900_v36 = vpop.f32.mrb[21].mxu0 }
 0x266   : > { %v1246_v37 = vpop.f32.mrb[18].mxu1  ;;  %v1298_v38 = vpop.f32.mrb[22].mxu0 }
 0x267   : > { %v4893_v39 = vpop.f32.mrb[19].mxu1  ;;  %v4901_v40 = vpop.f32.mrb[23].mxu0  ;;  %4939 = vmatpush3.msra.mxu0 %v1244_v33  ;;  %4944 = vmatpush3.msra.mxu1 %v1296_v34  ;;  %v4442_v34 = vld [vmem:[%s6119_s6 + $0xa] ss:$0 sm:$0xff] }
 0x268   : > { %4948 = vmatprep.subr.mxu0 %v5309_v1  ;;  %4953 = vmatprep.subr.mxu1 %v5309_v1  ;;  %v4443_v39 = vld [vmem:[%s6119_s6 + $0xb] ss:$0 sm:$0xff] }
 0x26c   : > { %v5643_v41 = vpop.f32.mrb[20].mxu1  ;;  %v5645_v42 = vpop.f32.mrb[24].mxu0 }
 0x26d   : > { %v4908_v43 = vpop.f32.mrb[21].mxu1  ;;  %v4916_v44 = vpop.f32.mrb[25].mxu0  ;;  %v1348_v38 = vadd.f32 %v4442_v34, %v5643_v41 }
 0x26e   : > { %v1350_v45 = vpop.f32.mrb[22].mxu1  ;;  %v1402_v46 = vpop.f32.mrb[26].mxu0  ;;  %v1400_v44 = vadd.f32 %v4443_v39, %v5645_v42  ;;  %v701_v42 = vld [vmem:[%s6120_s7] sm:$0xf] }
 0x26f   : > { %v4909_v47 = vpop.f32.mrb[23].mxu1  ;;  %v4917_v48 = vpop.f32.mrb[27].mxu0 }
 0x270   : > { %v2061_v48 = vsel %vm2059_vm4, %v701_v42, 0 }
 0x32d   : > { %v1478_v52 = vpop.f32.mrb[28].mxu0  ;;  %v1554_v53 = vpop.f32.mrb[24].mxu1 }
 0x32e   : > { %v1710_v54 = vmul.f32 0.35355338, %v1478_v52  ;;  %v1711_v55 = vmul.f32 0.35355338, %v1554_v53  ;;  %v4922_v56 = vpop.f32.mrb[29].mxu0  ;;  %v4927_v57 = vpop.f32.mrb[25].mxu1 }
 0x32f   : > { %v703_v52 = vld [vmem:[%s6120_s7 + $0x8] sm:$0xf]  ;;  %v704_v57 = vld [vmem:[%s6120_s7 + $0xc] sm:$0xf] }
 0x330   : > { %v1715_v58 = vadd.f32 %v1711_v55, %v5654_v51  ;;  %v1714_v59 = vadd.f32 %v1710_v54, %v5654_v51  ;;  %v2163_v56 = vsel %vm2059_vm4, %v703_v52, 0 }
 0x332   : > { %v1721_v60 = vsel %vm1405_vm3, %v1715_v58, -inf  ;;  %v1718_v61 = vsel %vm1405_vm3, %v1714_v59, -inf }
 0x333   : > { %1722 = vmax.xlane.f32.xlu1 %v1721_v60  ;;  %1719 = vmax.xlane.f32.xlu0 %v1718_v61  ;;  %v2211_v61 = vsel %vm2059_vm4, %v704_v57, 0 }
 0x335   : > { %v1630_v62 = vpop.f32.mrb[30].mxu0  ;;  %v1706_v63 = vpop.f32.mrb[26].mxu1 }
 0x336   : > { %v1712_v0 = vmul.f32 0.35355338, %v1630_v62  ;;  %v1713_v2 = vmul.f32 0.35355338, %v1706_v63  ;;  %v4932_v3 = vpop.f32.mrb[31].mxu0  ;;  %v4937_v4 = vpop.f32.mrb[27].mxu1 }
 0x338   : > { %v1716_v6 = vadd.f32 %v1712_v0, %v5654_v51  ;;  %v1717_v8 = vadd.f32 %v1713_v2, %v5654_v51 }
 0x33a   : > { %v1724_v7 = vsel %vm1405_vm3, %v1716_v6, -inf  ;;  %v1727_v9 = vsel %vm1405_vm3, %v1717_v8, -inf }
 0x33b   : > { %1725 = vmax.xlane.f32.xlu1 %v1724_v7 }
 0x33f   : > { %1728 = vmax.xlane.f32.xlu1 %v1727_v9 }
 0x3c0   : > { %v1723_v10 = vpop.xlane.xlu1 %1722  ;;  %v1720_v11 = vpop.xlane.xlu0 %1719 }
 0x3c1   : > { %v1731_v12 = vsub.f32 %v1715_v58, %v1723_v10  ;;  %v1730_v13 = vsub.f32 %v1714_v59, %v1720_v11 }
 0x3c3   : > { %v1734_v14 = vmul.f32 1.442695, %v1730_v13  ;;  %v1736_v15 = vmul.f32 1.442695, %v1731_v12 }
 0x3c5   : > { %5260 = vpow2.f32 %v1734_v14 }
 0x3c6   : > { %5262 = vpow2.f32 %v1736_v15 }
 0x3c8   : > { %v1726_v16 = vpop.xlane.xlu1 %1725 }
 0x3c9   : > { %v1732_v17 = vsub.f32 %v1716_v6, %v1726_v16  ;;  %v4493_v6 = vld [vmem:[%s6121_s8] ss:$0 sm:$0xff] }
 0x3cb   : > { %v1738_v18 = vmul.f32 1.442695, %v1732_v17 }
 0x3cc   : > { %v1729_v20 = vpop.xlane.xlu1 %1728 }
 0x3cd   : > { %5264 = vpow2.f32 %v1738_v18  ;;  %v1733_v21 = vsub.f32 %v1717_v8, %v1729_v20 }
 0x3cf   : > { %v1740_v22 = vmul.f32 1.442695, %v1733_v21  ;;  %v5261_v23 = vpop.eup %5260 }
 0x3d0   : > { %v1742_v24 = vsel %vm1405_vm3, %v5261_v23, 0.0  ;;  %v5263_v25 = vpop.eup %5262 }
 0x3d1   : > { %5266 = vpow2.f32 %v1740_v22  ;;  %1743 = vadd.xlane.f32.xlu1 %v1742_v24  ;;  %v1745_v26 = vsel %vm1405_vm3, %v5263_v25, 0.0 }
 0x3d5   : > { %1746 = vadd.xlane.f32.xlu1 %v1745_v26 }
 0x3d7   : > { %v5265_v27 = vpop.eup %5264 }
 0x3d8   : > { %v1748_v28 = vsel %vm1405_vm3, %v5265_v27, 0.0 }
 0x3d9   : > { %1749 = vadd.xlane.f32.xlu1 %v1748_v28 }
 0x3db   : > { %v5267_v29 = vpop.eup %5266 }
 0x3dc   : > { %v1751_v30 = vsel %vm1405_vm3, %v5267_v29, 0.0 }
 0x3dd   : > { %1752 = vadd.xlane.f32.xlu1 %v1751_v30 }
 0x45e   : > { %v1744_v31 = vpop.xlane.xlu1 %1743 }
 0x45f   : > { %5268 = vrcp.f32 %v1744_v31 }
 0x462   : > { %v1747_v32 = vpop.xlane.xlu1 %1746 }
 0x463   : > { %5270 = vrcp.f32 %v1747_v32 }
 0x466   : > { %v1750_v33 = vpop.xlane.xlu1 %1749 }
 0x467   : > { %5272 = vrcp.f32 %v1750_v33 }
 0x469   : > { %v5269_v35 = vpop.eup %5268 }
 0x46a   : > { %v1755_v36 = vmul.f32 %v5269_v35, %v5261_v23  ;;  %v1753_v37 = vpop.xlane.xlu1 %1752  ;;  %v5224_v35 = vld [vmem:[%s6122_s9] sm:$0xff]  }
 0x46b   : > { %5274 = vrcp.f32 %v1753_v37  ;;  %v5227_v37 = vld [vmem:[%s6124_s11 + $0x8] sm:$0xff]  }
 0x46c   : > { %4941 = vmatmul.mubr.msk.f32.vlgmr.msra.gmra.mrb[32].mxu0 %vm1405_vm3, %v1755_v36  ;;  %v5225_v36 = vld [vmem:[%s6122_s9 + $0x8] sm:$0xff]  }
 0x46d   : > { %v5271_v40 = vpop.eup %5270  ;;  %4949 = vmatpush3.msra.mxu0 %v1348_v38  ;;  %4950 = vmatprep.mubr.msk.f32.mxu0 %vm5310_vm0, %v5309_v1 }
 0x46e   : > { %v1757_v43 = vmul.f32 %v5271_v40, %v5263_v25  ;;  %4958 = vmatprep.subr.bf16.mxu0 %v5309_v1 }
 0x470   : > { %4946 = vmatmul.mubr.msk.f32.vlgmr.msra.gmra.mrb[28].mxu1 %vm1405_vm3, %v1757_v43 }
 0x471   : > { %v5273_v41 = vpop.eup %5272  ;;  %4954 = vmatpush3.msra.mxu1 %v1400_v44  ;;  %4955 = vmatprep.mubr.msk.f32.mxu1 %vm5310_vm0, %v5309_v1  ;;  %v4497_v44 = vld [vmem:[%s6126_s13] ss:$0 sm:$0xff] }
 0x472   : > { %v1759_v45 = vmul.f32 %v5273_v41, %v5265_v27  ;;  %4964 = vmatprep.subr.bf16.mxu1 %v5309_v1 }
 0x474   : > { %4951 = vmatmul.mubr.msk.f32.vlgmr.msra.gmra.mrb[34].mxu0 %vm1405_vm3, %v1759_v45  ;;  %v4498_v45 = vld [vmem:[%s6127_s14] ss:$0 sm:$0xff] }
 0x475   : > { %v5275_v46 = vpop.eup %5274  ;;  %4960 = vmatprep.mubr.msk.bf16.mxu0 %vm5310_vm0, %v5309_v1  ;;  %4959 = vmatpush3.bf16.msra.mxu0 %v2061_v48  ;;  %v5228_v48 = vld [vmem:[%s6124_s11 + $0x10] sm:$0xff]  }
 0x476   : > { %v1761_v47 = vmul.f32 %v5275_v46, %v5267_v29  ;;  %4970 = vmatprep.subr.bf16.mxu0 %v5309_v1 }
 0x478   : > { %4956 = vmatmul.mubr.msk.f32.vlgmr.msra.gmra.mrb[30].mxu1 %vm1405_vm3, %v1761_v47 }
 0x479   : > { %4966 = vmatprep.mubr.msk.bf16.mxu1 %vm5310_vm0, %v5309_v1  ;;  %4965 = vmatpush3.bf16.msra.mxu1 %v2115_v50  ;;  %v4499_v50 = vld [vmem:[%s6123_s10] ss:$0 sm:$0xff] }
 0x47a   : > { %4976 = vmatprep.subr.bf16.mxu1 %v5309_v1 }
 0x53f   : > { %v1831_v53 = vpop.f32.mrb[32].mxu0 }
 0x540   : > { %v2055_v54 = vpack.c.bf16 %v1831_v53, %v1831_v53  ;;  %v4942_v55 = vpop.f32.mrb[33].mxu0 }
 0x542   : > { %4961 = vmatmul.mubr.msk.bf16.vlgmr.msra.gmra.mrb[36].mxu0 %vm1405_vm3, %v2055_v54 }
 0x543   : > { %v1904_v58 = vpop.f32.mrb[28].mxu1  ;;  %4971 = vmatpush3.bf16.msra.mxu0 %v2163_v56  ;;  %4972 = vmatprep.mubr.msk.bf16.mxu0 %vm5310_vm0, %v5309_v1 }
 0x544   : > { %v2110_v59 = vpack.c.bf16 %v1904_v58, %v1904_v58  ;;  %v4947_v60 = vpop.f32.mrb[29].mxu1  ;;  %4982 = vmatprep.subr.bf16.mxu0 %v5309_v1 }
 0x546   : > { %4967 = vmatmul.mubr.msk.bf16.vlgmr.msra.gmra.mrb[32].mxu1 %vm1405_vm3, %v2110_v59  ;;  %v4503_v59 = vld [vmem:[%s6125_s12] ss:$0 sm:$0xff] }
 0x547   : > { %v1977_v62 = vpop.f32.mrb[34].mxu0  ;;  %4977 = vmatpush3.bf16.msra.mxu1 %v2211_v61  ;;  %4978 = vmatprep.mubr.msk.bf16.mxu1 %vm5310_vm0, %v5309_v1 }
 0x548   : > { %v2158_v63 = vpack.c.bf16 %v1977_v62, %v1977_v62  ;;  %v4952_v0 = vpop.f32.mrb[35].mxu0  ;;  %4990 = vmatprep.subr.bf16.mxu1 %v5309_v1 }
 0x54a   : > { %4973 = vmatmul.mubr.msk.bf16.vlgmr.msra.gmra.mrb[40].mxu0 %vm1405_vm3, %v2158_v63 }
 0x54b   : > { %v2050_v2 = vpop.f32.mrb[30].mxu1  ;;  %4986 = vmatprep.mubr.msk.bf16.mxu0 %vm5310_vm0, %v5309_v1  ;;  %4983 = vmatpush3.bf16.msra.mxu0 %v5224_v35  ;;  %v5244_v35 = vld [vmem:[%s6118_s5 + $0x118] sm:$0xff]  }
 0x54c   : > { %v2206_v3 = vpack.c.bf16 %v2050_v2, %v2050_v2  ;;  %v4957_v4 = vpop.f32.mrb[31].mxu1  ;;  %4984 = vmatprep.subr.bf16.mxu0 %v5309_v1 }
 0x54e   : > { %4979 = vmatmul.mubr.msk.bf16.vlgmr.msra.gmra.mrb[36].mxu1 %vm1405_vm3, %v2206_v3 }
 0x54f   : > { %4998 = vmatprep.mubr.msk.bf16.mxu1 %vm5310_vm0, %v5309_v1  ;;  %4985 = vmatpush3.bf16.msra.mxu0 %v5225_v36  ;;  %v5245_v36 = vld [vmem:[%s6118_s5 + $0x148] sm:$0xff]  }
 0x550   : > { %5002 = vmatprep.subr.bf16.mxu0 %v5309_v1 }
 0x615   : > { %v2097_v7 = vpop.f32.mrb[36].mxu0 }
 0x616   : > { %v4962_v8 = vpop.f32.mrb[37].mxu0  ;;  %v2109_v10 = vadd.f32 %v4493_v6, %v2097_v7 }
 0x617   : > { %v2100_v9 = vpop.f32.mrb[38].mxu0 }
 0x618   : > { %v4963_v11 = vpop.f32.mrb[39].mxu0 }
 0x619   : > { %v2151_v12 = vpop.f32.mrb[32].mxu1  ;;  %v5231_v11 = vld [vmem:[%s6118_s5 + $0xe0] sm:$0xff]  }
 0x61a   : > { %v2157_v13 = vadd.f32 %v2151_v12, %v2109_v10  ;;  %v4968_v14 = vpop.f32.mrb[33].mxu1  ;;  %v5230_v10 = vld [vmem:[%s6118_s5 + $0xc0] sm:$0xff]   ;;  %v5232_v12 = vld [vmem:[%s6118_s5 + $0xc8] sm:$0xff]  }
 0x61b   : > { %v2154_v15 = vpop.f32.mrb[34].mxu1 }
 0x61c   : > { %v4969_v16 = vpop.f32.mrb[35].mxu1 }
 0x61d   : > { %v2199_v17 = vpop.f32.mrb[40].mxu0 }
 0x61e   : > { %v2205_v18 = vadd.f32 %v2199_v17, %v2157_v13  ;;  %v4974_v20 = vpop.f32.mrb[41].mxu0  ;;  %v5233_v13 = vld [vmem:[%s6118_s5 + $0xe8] sm:$0xff]  }
 0x61f   : > { %v2202_v21 = vpop.f32.mrb[42].mxu0 }
 0x620   : > { %v4975_v22 = vpop.f32.mrb[43].mxu0  ;;  %v4510_v21 = vld [vmem:[%s6129_s16] ss:$0 sm:$0xff] }
 0x621   : > { %v2247_v23 = vpop.f32.mrb[36].mxu1 }
 0x622   : > { %v2253_v24 = vadd.f32 %v2247_v23, %v2205_v18  ;;  %v4980_v25 = vpop.f32.mrb[37].mxu1  ;;  %v4509_v18 = vld [vmem:[%s6128_s15] ss:$0 sm:$0xff] }
 0x623   : > { %v2250_v26 = vpop.f32.mrb[38].mxu1  ;;  %v5235_v25 = vld [vmem:[%s6118_s5 + $0x100] sm:$0xff]  }
 0x624   : > { %v4981_v27 = vpop.f32.mrb[39].mxu1  ;;  %v2254_v28 = vadd.f32 %v2253_v24, %v5457_v19  ;;  %v5226_v19 = vld [vmem:[%s6124_s11] sm:$0xff]   ;;  %v5234_v24 = vld [vmem:[%s6118_s5 + $0xd0] sm:$0xff]  }
 0x625   : > { %4991 = vmatpush3.bf16.msra.mxu1 %v5226_v19  ;;  %v5236_v27 = vld [vmem:[%s6118_s5 + $0xd8] sm:$0xff]   ;;  %v5246_v19 = vld [vmem:[%s6118_s5 + $0x130] sm:$0xff]  }
 0x626   : > { %v2257_v29 = vsel %vm585_vm2, %v2254_v28, 0.0  ;;  %4992 = vmatprep.subr.bf16.mxu1 %v5309_v1 }
 0x627   : > { %2258 = vadd.xlane.f32.xlu1 %v2257_v29  ;;  %v5238_v29 = vld [vmem:[%s6118_s5 + $0xf0] sm:$0xff]  }
 0x629   : > { %4993 = vmatpush3.bf16.msra.mxu1 %v5227_v37  ;;  %v5247_v37 = vld [vmem:[%s6118_s5 + $0x160] sm:$0xff]  }
 0x62a   : > { %4994 = vmatprep.subr.bf16.mxu1 %v5309_v1 }
 0x62d   : > { %4995 = vmatpush3.bf16.msra.mxu1 %v5228_v48 }
 0x62e   : > { %4996 = vmatprep.subr.bf16.mxu1 %v5309_v1 }
 0x631   : > { %4997 = vmatpush3.bf16.msra.mxu1 %v5229_v49 }
 0x632   : > { %5018 = vmatprep.subr.bf16.mxu1 %v5309_v1 }
 0x6b4   : > { %v2259_v30 = vpop.xlane.xlu1 %2258 }
 0x6b5   : > { %v2261_v31 = vmul.f32 0.03125, %v2259_v30  ;;  %v5239_v30 = vld [vmem:[%s6118_s5 + $0x120] sm:$0xff]  }
 0x6b7   : > { %v2262_v32 = vsub.f32 %v2254_v28, %v2261_v31  ;;  %v5237_v28 = vld [vmem:[%s6118_s5 + $0x108] sm:$0xff]   ;;  %v5240_v31 = vld [vmem:[%s6118_s5 + $0xf8] sm:$0xff]  }
 0x6b9   : > { %v2263_v33 = vmul.f32 %v2262_v32, %v2262_v32 }
 0x6bb   : > { %v2264_v34 = vsel %vm585_vm2, %v2263_v33, 0.0  ;;  %v5242_v33 = vld [vmem:[%s6118_s5 + $0x110] sm:$0xff]  }
 0x6bc   : > { %2265 = vadd.xlane.f32.xlu1 %v2264_v34  ;;  %v5243_v34 = vld [vmem:[%s6118_s5 + $0x140] sm:$0xff]  }
 0x749   : > { %v2266_v38 = vpop.xlane.xlu1 %2265 }
 0x74a   : > { %v2267_v39 = vmul.f32 0.03125, %v2266_v38  ;;  %v5248_v38 = vld [vmem:[%s6118_s5 + $0x138] sm:$0xff]  }
 0x74c   : > { %v2268_v40 = vadd.f32 1e-05, %v2267_v39  ;;  %v5249_v39 = vld [vmem:[%s6118_s5 + $0x168] sm:$0xff]  }
 0x74e   : > { %5276 = vrsqrt.f32 %v2268_v40  ;;  %v5250_v40 = vld [vmem:[%s6118_s5 + $0x150] sm:$0xff]  }
 0x758   : > { %v5277_v43 = vpop.eup %5276 }
 0x759   : > { %v2270_v41 = vmul.f32 %v5277_v43, %v2262_v32  ;;  %v5241_v32 = vld [vmem:[%s6118_s5 + $0x128] sm:$0xff]   ;;  %v5251_v43 = vld [vmem:[%s6118_s5 + $0x158] sm:$0xff]  }
 0x75b   : > { %v2277_v46 = vmul.f32 %v4497_v44, %v2270_v41  ;;  %v5252_v44 = vld [vmem:[%s6118_s5 + $0x170] sm:$0xff]   ;;  %v5253_v41 = vld [vmem:[%s6118_s5 + $0x178] sm:$0xff]  }
 0x75d   : > { %v2284_v47 = vadd.f32 %v4498_v45, %v2277_v46 }
 0x75f   : > { %v2289_v42 = vpack.c.bf16 %v2284_v47, %v2284_v47 }
 0x761   : > { %4987 = vmatmul.mubr.msk.bf16.vlgmr.msra.gmra.mrb[44].mxu0 %vm585_vm2, %v2289_v42 }
 0x762   : > { %5006 = vmatprep.mubr.msk.bf16.mxu0 %vm5310_vm0, %v5309_v1  ;;  %5003 = vmatpush3.bf16.msra.mxu0 %v5230_v10 }
 0x763   : > { %5004 = vmatprep.subr.bf16.mxu0 %v5309_v1 }
 0x766   : > { %5005 = vmatpush3.bf16.msra.mxu0 %v5232_v12 }
 0x767   : > { %5010 = vmatprep.subr.bf16.mxu0 %v5309_v1 }
 0x834   : > { %v2346_v52 = vpop.f32.mrb[44].mxu0 }
 0x835   : > { %v2347_v53 = vadd.f32 %v4499_v50, %v2346_v52  ;;  %v4988_v54 = vpop.f32.mrb[45].mxu0 }
 0x836   : > { %v2349_v55 = vpop.f32.mrb[46].mxu0 }
 0x837   : > { %v2352_v56 = vmax.f32 %v2347_v53, 0.0  ;;  %v4989_v57 = vpop.f32.mrb[47].mxu0  ;;  %v4579_v53 = vld [vmem:[%s6119_s6 + $0x10] ss:$0 sm:$0xff] }
 0x839   : > { %v2361_v58 = vpack.c.bf16 %v2352_v56, %v2352_v56  ;;  %v4575_v56 = vld [vmem:[%s6119_s6 + $0xc] ss:$0 sm:$0xff] }
 0x83b   : > { %4999 = vmatmul.mubr.msk.bf16.vlgmr.msra.gmra.mrb[40].mxu1 %vm2393_vm5, %v2361_v58 }
 0x83c   : > { %5022 = vmatprep.mubr.msk.bf16.mxu1 %vm5310_vm0, %v5309_v1  ;;  %5019 = vmatpush3.bf16.msra.mxu1 %v5231_v11 }
 0x83d   : > { %5020 = vmatprep.subr.bf16.mxu1 %v5309_v1 }
 0x840   : > { %5021 = vmatpush3.bf16.msra.mxu1 %v5233_v13 }
 0x841   : > { %5034 = vmatprep.subr.bf16.mxu1 %v5309_v1 }
 0x90e   : > { %v2431_v60 = vpop.f32.mrb[40].mxu1 }
 0x90f   : > { %v2432_v61 = vadd.f32 %v4503_v59, %v2431_v60  ;;  %v5000_v62 = vpop.f32.mrb[41].mxu1 }
 0x910   : > { %v2434_v63 = vpop.f32.mrb[42].mxu1 }
 0x911   : > { %v5001_v0 = vpop.f32.mrb[43].mxu1  ;;  %v2437_v2 = vadd.f32 %v2432_v61, %v2284_v47 }
 0x913   : > { %v2440_v3 = vsel %vm585_vm2, %v2437_v2, 0.0 }
 0x914   : > { %2441 = vadd.xlane.f32.xlu0 %v2440_v3 }
 0x9a1   : > { %v2442_v4 = vpop.xlane.xlu0 %2441 }
 0x9a2   : > { %v2443_v6 = vmul.f32 0.03125, %v2442_v4 }
 0x9a4   : > { %v2444_v7 = vsub.f32 %v2437_v2, %v2443_v6  ;;  %v4581_v2 = vld [vmem:[%s6119_s6 + $0x12] ss:$0 sm:$0xff]  ;;  %v4577_v6 = vld [vmem:[%s6119_s6 + $0xe] ss:$0 sm:$0xff] }
 0x9a6   : > { %v2445_v8 = vmul.f32 %v2444_v7, %v2444_v7 }
 0x9a8   : > { %v2446_v9 = vsel %vm585_vm2, %v2445_v8, 0.0 }
 0x9a9   : > { %2447 = vadd.xlane.f32.xlu1 %v2446_v9 }
 0xa36   : > { %v2448_v14 = vpop.xlane.xlu1 %2447 }
 0xa37   : > { %v2449_v15 = vmul.f32 0.03125, %v2448_v14 }
 0xa39   : > { %v2450_v16 = vadd.f32 1e-05, %v2449_v15  ;;  %v4580_v15 = vld [vmem:[%s6119_s6 + $0x11] ss:$0 sm:$0xff] }
 0xa3b   : > { %5278 = vrsqrt.f32 %v2450_v16  ;;  %v4583_v16 = vld [vmem:[%s6119_s6 + $0x14] ss:$0 sm:$0xff] }
 0xa45   : > { %v5279_v17 = vpop.eup %5278 }
 0xa46   : > { %v2452_v20 = vmul.f32 %v5279_v17, %v2444_v7 }
 0xa48   : > { %v2459_v22 = vmul.f32 %v4509_v18, %v2452_v20  ;;  %v4576_v20 = vld [vmem:[%s6119_s6 + $0xd] ss:$0 sm:$0xff] }
 0xa4a   : > { %v5794_v23 = vadd.f32 %v4510_v21, %v2459_v22 }
 0xa4c   : > { %v5804_v26 = vpack.c.bf16 %v5794_v23, %v5794_v23 }
 0xa4e   : > { %5007 = vmatmul.mubr.msk.bf16.vlgmr.msra.gmra.mrb[48].mxu0 %vm585_vm2, %v5804_v26  ;;  %5023 = vmatmul.mubr.msk.bf16.vlgmr.msra.gmra.mrb[44].mxu1 %vm585_vm2, %v5804_v26 }
 0xa4f   : > { %5011 = vmatpush3.bf16.msra.mxu0 %v5234_v24  ;;  %5035 = vmatpush3.bf16.msra.mxu1 %v5235_v25 }
 0xa50   : > { %5012 = vmatprep.subr.bf16.mxu0 %v5309_v1  ;;  %5036 = vmatprep.subr.bf16.mxu1 %v5309_v1 }
 0xa51   : > { %5014 = vmatprep.mubr.msk.bf16.mxu0 %vm5310_vm0, %v5309_v1  ;;  %5038 = vmatprep.mubr.msk.bf16.mxu1 %vm5310_vm0, %v5309_v1 }
 0xa53   : > { %5013 = vmatpush3.bf16.msra.mxu0 %v5236_v27  ;;  %5037 = vmatpush3.bf16.msra.mxu1 %v5237_v28 }
 0xa54   : > { %5026 = vmatprep.subr.bf16.mxu0 %v5309_v1  ;;  %5050 = vmatprep.subr.bf16.mxu1 %v5309_v1 }
 0xa56   : > { %5015 = vmatmul.mubr.msk.bf16.vlgmr.msra.gmra.mrb[52].mxu0 %vm585_vm2, %v5804_v26  ;;  %5039 = vmatmul.mubr.msk.bf16.vlgmr.msra.gmra.mrb[48].mxu1 %vm585_vm2, %v5804_v26 }
 0xa57   : > { %5027 = vmatpush3.bf16.msra.mxu0 %v5238_v29  ;;  %5051 = vmatpush3.bf16.msra.mxu1 %v5239_v30 }
 0xa58   : > { %5028 = vmatprep.subr.bf16.mxu0 %v5309_v1  ;;  %5052 = vmatprep.subr.bf16.mxu1 %v5309_v1 }
 0xa59   : > { %5030 = vmatprep.mubr.msk.bf16.mxu0 %vm5310_vm0, %v5309_v1  ;;  %5054 = vmatprep.mubr.msk.bf16.mxu1 %vm5310_vm0, %v5309_v1 }
 0xa5b   : > { %5029 = vmatpush3.bf16.msra.mxu0 %v5240_v31  ;;  %5053 = vmatpush3.bf16.msra.mxu1 %v5241_v32  ;;  %v4582_v31 = vld [vmem:[%s6119_s6 + $0x13] ss:$0 sm:$0xff] }
 0xa5c   : > { %5042 = vmatprep.subr.bf16.mxu0 %v5309_v1  ;;  %5066 = vmatprep.subr.bf16.mxu1 %v5309_v1 }
 0xa5e   : > { %5031 = vmatmul.mubr.msk.bf16.vlgmr.msra.gmra.mrb[56].mxu0 %vm585_vm2, %v5804_v26  ;;  %5055 = vmatmul.mubr.msk.bf16.vlgmr.msra.gmra.mrb[52].mxu1 %vm585_vm2, %v5804_v26 }
 0xa5f   : > { %5043 = vmatpush3.bf16.msra.mxu0 %v5242_v33  ;;  %5067 = vmatpush3.bf16.msra.mxu1 %v5243_v34  ;;  %v4578_v34 = vld [vmem:[%s6119_s6 + $0xf] ss:$0 sm:$0xff] }
 0xa60   : > { %5044 = vmatprep.subr.bf16.mxu0 %v5309_v1  ;;  %5068 = vmatprep.subr.bf16.mxu1 %v5309_v1 }
 0xa61   : > { %5046 = vmatprep.mubr.msk.bf16.mxu0 %vm5310_vm0, %v5309_v1  ;;  %5070 = vmatprep.mubr.msk.bf16.mxu1 %vm5310_vm0, %v5309_v1 }
 0xa63   : > { %5045 = vmatpush3.bf16.msra.mxu0 %v5244_v35  ;;  %5069 = vmatpush3.bf16.msra.mxu1 %v5245_v36 }
 0xa64   : > { %5058 = vmatprep.subr.bf16.mxu0 %v5309_v1  ;;  %5082 = vmatprep.subr.bf16.mxu1 %v5309_v1 }
 0xa66   : > { %5047 = vmatmul.mubr.msk.bf16.vlgmr.msra.gmra.mrb[60].mxu0 %vm585_vm2, %v5804_v26  ;;  %5071 = vmatmul.mubr.msk.bf16.vlgmr.msra.gmra.mrb[56].mxu1 %vm585_vm2, %v5804_v26 }
 0xa67   : > { %5059 = vmatpush3.bf16.msra.mxu0 %v5246_v19  ;;  %5083 = vmatpush3.bf16.msra.mxu1 %v5247_v37 }
 0xa68   : > { %5060 = vmatprep.subr.bf16.mxu0 %v5309_v1  ;;  %5084 = vmatprep.subr.bf16.mxu1 %v5309_v1 }
 0xa69   : > { %5062 = vmatprep.mubr.msk.bf16.mxu0 %vm5310_vm0, %v5309_v1  ;;  %5086 = vmatprep.mubr.msk.bf16.mxu1 %vm5310_vm0, %v5309_v1 }
 0xa6b   : > { %5061 = vmatpush3.bf16.msra.mxu0 %v5248_v38  ;;  %5085 = vmatpush3.bf16.msra.mxu1 %v5249_v39 }
 0xa6c   : > { %5074 = vmatprep.subr.bf16.mxu0 %v5309_v1  ;;  %5098 = vmatprep.subr.mxu1 %v5309_v1 }
 0xa6e   : > { %5063 = vmatmul.mubr.msk.bf16.vlgmr.msra.gmra.mrb[64].mxu0 %vm585_vm2, %v5804_v26  ;;  %5087 = vmatmul.mubr.msk.bf16.vlgmr.msra.gmra.mrb[60].mxu1 %vm585_vm2, %v5804_v26 }
 0xa6f   : > { %5075 = vmatpush3.bf16.msra.mxu0 %v5250_v40  ;;  %5078 = vmatprep.mubr.msk.bf16.mxu0 %vm5310_vm0, %v5309_v1 }
 0xa70   : > { %5076 = vmatprep.subr.bf16.mxu0 %v5309_v1  ;;  %5100 = vmatprep.mubr.msk.f32.mxu1 %vm5310_vm0, %v5309_v1 }
 0xa73   : > { %5077 = vmatpush3.bf16.msra.mxu0 %v5251_v43 }
 0xa74   : > { %5090 = vmatprep.subr.bf16.mxu0 %v5309_v1 }
 0xa76   : > { %5079 = vmatmul.mubr.msk.bf16.vlgmr.msra.gmra.mrb[68].mxu0 %vm585_vm2, %v5804_v26 }
 0xa77   : > { %5091 = vmatpush3.bf16.msra.mxu0 %v5252_v44  ;;  %5094 = vmatprep.mubr.msk.bf16.mxu0 %vm5310_vm0, %v5309_v1  ;;  %v4584_v44 = vld [vmem:[%s6119_s6 + $0x15] ss:$0 sm:$0xff] }
 0xa78   : > { %5092 = vmatprep.subr.bf16.mxu0 %v5309_v1 }
 0xa7b   : > { %5093 = vmatpush3.bf16.msra.mxu0 %v5253_v41 }
 0xa7c   : > { %5108 = vmatprep.subr.mxu0 %v5309_v1 }
 0xa7e   : > { %5095 = vmatmul.mubr.msk.bf16.vlgmr.msra.gmra.mrb[72].mxu0 %vm585_vm2, %v5804_v26 }
 0xa7f   : > { %5110 = vmatprep.mubr.msk.f32.mxu0 %vm5310_vm0, %v5309_v1 }
 0xb21   : > { %v2656_v45 = vpop.f32.mrb[48].mxu0  ;;  %v2760_v46 = vpop.f32.mrb[44].mxu1 }
 0xb22   : > { %v5008_v47 = vpop.f32.mrb[49].mxu0  ;;  %v5024_v42 = vpop.f32.mrb[45].mxu1  ;;  %v2657_v0 = vadd.f32 %v4575_v56, %v2656_v45  ;;  %v2761_v14 = vadd.f32 %v4577_v6, %v2760_v46 }
 0xb23   : > { %v2659_v48 = vpop.f32.mrb[50].mxu0  ;;  %v2763_v49 = vpop.f32.mrb[46].mxu1 }
 0xb24   : > { %v5009_v50 = vpop.f32.mrb[51].mxu0  ;;  %v5025_v52 = vpop.f32.mrb[47].mxu1 }
 0xb29   : > { %v2708_v54 = vpop.f32.mrb[52].mxu0  ;;  %v2864_v55 = vpop.f32.mrb[48].mxu1 }
 0xb2a   : > { %v2865_v57 = vadd.f32 %v4579_v53, %v2864_v55  ;;  %v5016_v58 = vpop.f32.mrb[53].mxu0  ;;  %v5040_v59 = vpop.f32.mrb[49].mxu1  ;;  %v2709_v30 = vadd.f32 %v4576_v20, %v2708_v54 }
 0xb2b   : > { %v2711_v60 = vpop.f32.mrb[54].mxu0  ;;  %v2867_v61 = vpop.f32.mrb[50].mxu1 }
 0xb2c   : > { %v5017_v62 = vpop.f32.mrb[55].mxu0  ;;  %v5041_v63 = vpop.f32.mrb[51].mxu1  ;;  %5099 = vmatpush3.xpose.msk.msra.mxu1 %vm1405_vm3, %v2865_v57 }
 0xb2d   : > { %5103 = vmatprep.subr.mxu1 %v5309_v1 }
 0xb2f   : > { %5101 = vmatmul.mubr.msk.f32.vlgmr.msra.gmra.mrb[64].mxu1 %vm1405_vm3, %v2657_v0 }
 0xb30   : > { %5105 = vmatprep.mubr.msk.f32.mxu1 %vm5310_vm0, %v5309_v1 }
 0xb31   : > { %v2812_v3 = vpop.f32.mrb[56].mxu0  ;;  %v2968_v4 = vpop.f32.mrb[52].mxu1 }
 0xb32   : > { %v2969_v7 = vadd.f32 %v4581_v2, %v2968_v4  ;;  %v5032_v8 = vpop.f32.mrb[57].mxu0  ;;  %v5056_v9 = vpop.f32.mrb[53].mxu1  ;;  %v2813_v43 = vadd.f32 %v4578_v34, %v2812_v3 }
 0xb33   : > { %v2815_v10 = vpop.f32.mrb[58].mxu0  ;;  %v2971_v11 = vpop.f32.mrb[54].mxu1 }
 0xb34   : > { %v5033_v12 = vpop.f32.mrb[59].mxu0  ;;  %v5057_v13 = vpop.f32.mrb[55].mxu1  ;;  %5109 = vmatpush3.xpose.msk.msra.mxu0 %vm1405_vm3, %v2969_v7 }
 0xb35   : > { %5118 = vmatprep.subr.mxu0 %v5309_v1 }
 0xb37   : > { %5111 = vmatmul.mubr.msk.f32.vlgmr.msra.gmra.mrb[76].mxu0 %vm1405_vm3, %v2761_v14 }
 0xb38   : > { %5120 = vmatprep.mubr.msk.f32.mxu0 %vm5310_vm0, %v5309_v1 }
 0xb39   : > { %v2916_v17 = vpop.f32.mrb[60].mxu0  ;;  %v3072_v18 = vpop.f32.mrb[56].mxu1 }
 0xb3a   : > { %v2917_v21 = vadd.f32 %v4580_v15, %v2916_v17  ;;  %v3073_v22 = vadd.f32 %v4583_v16, %v3072_v18  ;;  %v5048_v24 = vpop.f32.mrb[61].mxu0  ;;  %v5072_v25 = vpop.f32.mrb[57].mxu1 }
 0xb3b   : > { %v2919_v26 = vpop.f32.mrb[62].mxu0  ;;  %v3075_v27 = vpop.f32.mrb[58].mxu1 }
 0xb3c   : > { %v5049_v28 = vpop.f32.mrb[63].mxu0  ;;  %v5073_v29 = vpop.f32.mrb[59].mxu1  ;;  %5104 = vmatpush3.xpose.msk.msra.mxu1 %vm1405_vm3, %v2917_v21  ;;  %5119 = vmatpush3.msra.mxu0 %v3073_v22 }
 0xb3d   : > { %5113 = vmatprep.subr.mxu1 %v5309_v1  ;;  %5128 = vmatprep.subr.mxu0 %v5309_v1 }
 0xb3f   : > { %5106 = vmatmul.mubr.msk.f32.vlgmr.msra.gmra.mrb[66].mxu1 %vm1405_vm3, %v2709_v30 }
 0xb40   : > { %5115 = vmatprep.mubr.msk.f32.mxu1 %vm5310_vm0, %v5309_v1 }
 0xb41   : > { %v3020_v32 = vpop.f32.mrb[64].mxu0  ;;  %v5968_v33 = vpop.f32.mrb[60].mxu1 }
 0xb42   : > { %v3021_v35 = vadd.f32 %v4582_v31, %v3020_v32  ;;  %v5064_v36 = vpop.f32.mrb[65].mxu0  ;;  %v5088_v19 = vpop.f32.mrb[61].mxu1 }
 0xb43   : > { %v3023_v37 = vpop.f32.mrb[66].mxu0  ;;  %v3179_v38 = vpop.f32.mrb[62].mxu1 }
 0xb44   : > { %v5065_v39 = vpop.f32.mrb[67].mxu0  ;;  %v5089_v40 = vpop.f32.mrb[63].mxu1  ;;  %5114 = vmatpush3.xpose.msk.msra.mxu1 %vm1405_vm3, %v3021_v35  ;;  %v4585_v35 = vld [vmem:[%s6119_s6 + $0x16] ss:$0 sm:$0xff] }
 0xb45   : > { %5123 = vmatprep.subr.mxu1 %v5309_v1  ;;  %v3177_v37 = vadd.f32 %v4585_v35, %v5968_v33  ;;  %v4586_v33 = vld [vmem:[%s6119_s6 + $0x17] ss:$0 sm:$0xff] }
 0xb47   : > { %5116 = vmatmul.mubr.msk.f32.vlgmr.msra.gmra.mrb[68].mxu1 %vm1405_vm3, %v2813_v43 }
 0xb48   : > { %5125 = vmatprep.mubr.msk.f32.mxu1 %vm5310_vm0, %v5309_v1 }
 0xb49   : > { %v3124_v41 = vpop.f32.mrb[68].mxu0 }
 0xb4a   : > { %v3125_v45 = vadd.f32 %v4584_v44, %v3124_v41  ;;  %v5080_v46 = vpop.f32.mrb[69].mxu0 }
 0xb4b   : > { %v3127_v47 = vpop.f32.mrb[70].mxu0 }
 0xb4c   : > { %v5081_v42 = vpop.f32.mrb[71].mxu0  ;;  %5124 = vmatpush3.msra.mxu1 %v3125_v45 }
 0xb4d   : > { %5133 = vmatprep.subr.mxu1 %v5309_v1  ;;  %v4571_v42 = vld [vmem:[%s6120_s7 + $0x10] sm:$0xf] }
 0xb51   : > { %v5982_v48 = vpop.f32.mrb[72].mxu0 }
 0xb52   : > { %v5096_v49 = vpop.f32.mrb[73].mxu0  ;;  %v3229_v45 = vadd.f32 %v4586_v33, %v5982_v48  ;;  %v3889_v48 = vsel %vm2059_vm4, %v4571_v42, 0  ;;  %v4643_v33 = vld [vmem:[%s6126_s13 + $0x1] ss:$0 sm:$0xff]  ;;  %v5258_v42 = vld [vmem:[%s6124_s11 + $0x30] sm:$0xff]  }
 0xb53   : > { %v3231_v50 = vpop.f32.mrb[74].mxu0  ;;  %v4572_v49 = vld [vmem:[%s6120_s7 + $0x14] sm:$0xf] }
 0xb54   : > { %v5097_v52 = vpop.f32.mrb[75].mxu0  ;;  %v3943_v50 = vsel %vm2059_vm4, %v4572_v49, 0  ;;  %v4650_v49 = vld [vmem:[%s6123_s10 + $0x1] ss:$0 sm:$0xff] }
 0xb55   : > { %v4573_v52 = vld [vmem:[%s6120_s7 + $0x18] sm:$0xf] }
 0xc02   : > { %v3306_v53 = vpop.f32.mrb[64].mxu1 }
 0xc03   : > { %v3538_v54 = vmul.f32 0.35355338, %v3306_v53  ;;  %v5102_v55 = vpop.f32.mrb[65].mxu1 }
 0xc05   : > { %v3542_v56 = vadd.f32 %v3538_v54, %v5654_v51 }
 0xc07   : > { %v3546_v57 = vsel %vm1405_vm3, %v3542_v56, -inf }
 0xc08   : > { %3547 = vmax.xlane.f32.xlu0 %v3546_v57 }
 0xc0a   : > { %v3458_v58 = vpop.f32.mrb[76].mxu0 }
 0xc0b   : > { %v3540_v59 = vmul.f32 0.35355338, %v3458_v58  ;;  %v5112_v60 = vpop.f32.mrb[77].mxu0 }
 0xc0c   : > { %v4574_v60 = vld [vmem:[%s6120_s7 + $0x1c] sm:$0xf] }
 0xc0d   : > { %v3544_v61 = vadd.f32 %v3540_v59, %v5654_v51 }
 0xc0f   : > { %v3552_v62 = vsel %vm1405_vm3, %v3544_v61, -inf }
 0xc10   : > { %3553 = vmax.xlane.f32.xlu0 %v3552_v62 }
 0xc12   : > { %v3382_v63 = vpop.f32.mrb[66].mxu1 }
 0xc13   : > { %v3539_v0 = vmul.f32 0.35355338, %v3382_v63  ;;  %v5107_v2 = vpop.f32.mrb[67].mxu1 }
 0xc15   : > { %v3543_v3 = vadd.f32 %v3539_v0, %v5654_v51  ;;  %v4039_v0 = vsel %vm2059_vm4, %v4574_v60, 0 }
 0xc17   : > { %v3549_v4 = vsel %vm1405_vm3, %v3543_v3, -inf }
 0xc18   : > { %3550 = vmax.xlane.f32.xlu1 %v3549_v4 }
 0xc1a   : > { %v3534_v6 = vpop.f32.mrb[68].mxu1 }
 0xc1b   : > { %v3541_v7 = vmul.f32 0.35355338, %v3534_v6  ;;  %v5117_v8 = vpop.f32.mrb[69].mxu1 }
 0xc1d   : > { %v3545_v9 = vadd.f32 %v3541_v7, %v5654_v51 }
 0xc1f   : > { %v3555_v10 = vsel %vm1405_vm3, %v3545_v9, -inf }
 0xc20   : > { %3556 = vmax.xlane.f32.xlu1 %v3555_v10 }
 0xc95   : > { %v3548_v11 = vpop.xlane.xlu0 %3547 }
 0xc96   : > { %v3558_v12 = vsub.f32 %v3542_v56, %v3548_v11  ;;  %v3991_v56 = vsel %vm2059_vm4, %v4573_v52, 0 }
 0xc98   : > { %v3562_v13 = vmul.f32 1.442695, %v3558_v12 }
 0xc9a   : > { %5280 = vpow2.f32 %v3562_v13 }
 0xc9d   : > { %v3554_v14 = vpop.xlane.xlu0 %3553 }
 0xc9e   : > { %v3560_v15 = vsub.f32 %v3544_v61, %v3554_v14  ;;  %v4637_v14 = vld [vmem:[%s6121_s8 + $0x1] ss:$0 sm:$0xff] }
 0xca0   : > { %v3566_v16 = vmul.f32 1.442695, %v3560_v15 }
 0xca2   : > { %5282 = vpow2.f32 %v3566_v16 }
 0xca4   : > { %v5281_v17 = vpop.eup %5280 }
 0xca5   : > { %v3551_v18 = vpop.xlane.xlu1 %3550  ;;  %v3570_v20 = vsel %vm1405_vm3, %v5281_v17, 0.0 }
 0xca6   : > { %v3559_v21 = vsub.f32 %v3543_v3, %v3551_v18  ;;  %3571 = vadd.xlane.f32.xlu0 %v3570_v20 }
 0xca8   : > { %v3564_v22 = vmul.f32 1.442695, %v3559_v21 }
 0xcaa   : > { %5284 = vpow2.f32 %v3564_v22 }
 0xcac   : > { %v5283_v51 = vpop.eup %5282 }
 0xcad   : > { %v3557_v24 = vpop.xlane.xlu1 %3556  ;;  %v3576_v25 = vsel %vm1405_vm3, %v5283_v51, 0.0 }
 0xcae   : > { %v3561_v26 = vsub.f32 %v3545_v9, %v3557_v24  ;;  %3577 = vadd.xlane.f32.xlu0 %v3576_v25 }
 0xcb0   : > { %v3568_v27 = vmul.f32 1.442695, %v3561_v26 }
 0xcb2   : > { %5286 = vpow2.f32 %v3568_v27 }
 0xcb4   : > { %v5285_v28 = vpop.eup %5284 }
 0xcb5   : > { %v3573_v29 = vsel %vm1405_vm3, %v5285_v28, 0.0 }
 0xcb6   : > { %3574 = vadd.xlane.f32.xlu1 %v3573_v29 }
 0xcbc   : > { %v5287_v30 = vpop.eup %5286 }
 0xcbd   : > { %v3579_v31 = vsel %vm1405_vm3, %v5287_v30, 0.0 }
 0xcbe   : > { %3580 = vadd.xlane.f32.xlu1 %v3579_v31 }
 0xd33   : > { %v3572_v32 = vpop.xlane.xlu0 %3571 }
 0xd34   : > { %5288 = vrcp.f32 %v3572_v32 }
 0xd3b   : > { %v3578_v34 = vpop.xlane.xlu0 %3577 }
 0xd3c   : > { %5290 = vrcp.f32 %v3578_v34 }
 0xd3e   : > { %v5289_v36 = vpop.eup %5288 }
 0xd3f   : > { %v3583_v19 = vmul.f32 %v5289_v36, %v5281_v17  ;;  %v5254_v36 = vld [vmem:[%s6122_s9 + $0x10] sm:$0xff]  }
 0xd41   : > { %5121 = vmatmul.mubr.msk.f32.vlgmr.msra.gmra.mrb[78].mxu0 %vm1405_vm3, %v3583_v19  ;;  %v5255_v19 = vld [vmem:[%s6122_s9 + $0x18] sm:$0xff]  }
 0xd42   : > { %5129 = vmatpush3.msra.mxu0 %v3177_v37  ;;  %5130 = vmatprep.mubr.msk.f32.mxu0 %vm5310_vm0, %v5309_v1  ;;  %v5257_v37 = vld [vmem:[%s6124_s11 + $0x28] sm:$0xff]  }
 0xd43   : > { %v3575_v38 = vpop.xlane.xlu1 %3574  ;;  %5138 = vmatprep.subr.bf16.mxu0 %v5309_v1 }
 0xd44   : > { %5292 = vrcp.f32 %v3575_v38 }
 0xd46   : > { %v5291_v39 = vpop.eup %5290 }
 0xd47   : > { %v3587_v40 = vmul.f32 %v5291_v39, %v5283_v51 }
 0xd49   : > { %5131 = vmatmul.mubr.msk.f32.vlgmr.msra.gmra.mrb[80].mxu0 %vm1405_vm3, %v3587_v40 }
 0xd4a   : > { %5140 = vmatprep.mubr.msk.bf16.mxu0 %vm5310_vm0, %v5309_v1  ;;  %5139 = vmatpush3.bf16.msra.mxu0 %v3889_v48  ;;  %v5259_v48 = vld [vmem:[%s6124_s11 + $0x38] sm:$0xff]  }
 0xd4b   : > { %v3581_v43 = vpop.xlane.xlu1 %3580  ;;  %5150 = vmatprep.subr.bf16.mxu0 %v5309_v1 }
 0xd4c   : > { %5294 = vrcp.f32 %v3581_v43 }
 0xd4e   : > { %v5293_v44 = vpop.eup %5292 }
 0xd4f   : > { %v3585_v41 = vmul.f32 %v5293_v44, %v5285_v28 }
 0xd51   : > { %5126 = vmatmul.mubr.msk.f32.vlgmr.msra.gmra.mrb[70].mxu1 %vm1405_vm3, %v3585_v41  ;;  %v4644_v41 = vld [vmem:[%s6127_s14 + $0x1] ss:$0 sm:$0xff] }
 0xd52   : > { %5134 = vmatpush3.msra.mxu1 %v3229_v45  ;;  %5135 = vmatprep.mubr.msk.f32.mxu1 %vm5310_vm0, %v5309_v1 }
 0xd53   : > { %5144 = vmatprep.subr.bf16.mxu1 %v5309_v1 }
 0xd56   : > { %v5295_v46 = vpop.eup %5294 }
 0xd57   : > { %v3589_v47 = vmul.f32 %v5295_v46, %v5287_v30 }
 0xd59   : > { %5136 = vmatmul.mubr.msk.f32.vlgmr.msra.gmra.mrb[72].mxu1 %vm1405_vm3, %v3589_v47 }
 0xd5a   : > { %5146 = vmatprep.mubr.msk.bf16.mxu1 %vm5310_vm0, %v5309_v1  ;;  %5145 = vmatpush3.bf16.msra.mxu1 %v3943_v50 }
 0xd5b   : > { %5156 = vmatprep.subr.bf16.mxu1 %v5309_v1 }
 0xe14   : > { %v3659_v53 = vpop.f32.mrb[78].mxu0 }
 0xe15   : > { %v3884_v54 = vpack.c.bf16 %v3659_v53, %v3659_v53  ;;  %v5122_v55 = vpop.f32.mrb[79].mxu0 }
 0xe17   : > { %5141 = vmatmul.mubr.msk.bf16.vlgmr.msra.gmra.mrb[84].mxu0 %vm1405_vm3, %v3884_v54 }
 0xe18   : > { %5151 = vmatpush3.bf16.msra.mxu0 %v3991_v56  ;;  %5152 = vmatprep.mubr.msk.bf16.mxu0 %vm5310_vm0, %v5309_v1 }
 0xe19   : > { %5162 = vmatprep.subr.bf16.mxu0 %v5309_v1 }
 0xe1c   : > { %v3805_v57 = vpop.f32.mrb[80].mxu0 }
 0xe1d   : > { %v3986_v58 = vpack.c.bf16 %v3805_v57, %v3805_v57  ;;  %v5132_v59 = vpop.f32.mrb[81].mxu0 }
 0xe1f   : > { %5153 = vmatmul.mubr.msk.bf16.vlgmr.msra.gmra.mrb[88].mxu0 %vm1405_vm3, %v3986_v58 }
 0xe20   : > { %5166 = vmatprep.mubr.msk.bf16.mxu0 %vm5310_vm0, %v5309_v1  ;;  %5163 = vmatpush3.bf16.msra.mxu0 %v5254_v36 }
 0xe21   : > { %5164 = vmatprep.subr.bf16.mxu0 %v5309_v1 }
 0xe24   : > { %v3732_v61 = vpop.f32.mrb[70].mxu1  ;;  %5165 = vmatpush3.bf16.msra.mxu0 %v5255_v19 }
 0xe25   : > { %v3938_v62 = vpack.c.bf16 %v3732_v61, %v3732_v61  ;;  %v5127_v63 = vpop.f32.mrb[71].mxu1 }
 0xe27   : > { %5147 = vmatmul.mubr.msk.bf16.vlgmr.msra.gmra.mrb[76].mxu1 %vm1405_vm3, %v3938_v62 }
 0xe28   : > { %5157 = vmatpush3.bf16.msra.mxu1 %v4039_v0  ;;  %5158 = vmatprep.mubr.msk.bf16.mxu1 %vm5310_vm0, %v5309_v1 }
 0xe29   : > { %5170 = vmatprep.subr.bf16.mxu1 %v5309_v1 }
 0xe2c   : > { %v3878_v2 = vpop.f32.mrb[72].mxu1 }
 0xe2d   : > { %v4034_v3 = vpack.c.bf16 %v3878_v2, %v3878_v2  ;;  %v5137_v4 = vpop.f32.mrb[73].mxu1 }
 0xe2f   : > { %5159 = vmatmul.mubr.msk.bf16.vlgmr.msra.gmra.mrb[80].mxu1 %vm1405_vm3, %v4034_v3 }
 0xe30   : > { %5178 = vmatprep.mubr.msk.bf16.mxu1 %vm5310_vm0, %v5309_v1 }
 0xeea   : > { %v3925_v6 = vpop.f32.mrb[84].mxu0 }
 0xeeb   : > { %v5142_v7 = vpop.f32.mrb[85].mxu0  ;;  %v3937_v15 = vadd.f32 %v4637_v14, %v3925_v6  ;;  %v4672_v14 = vld [vmem:[%s6129_s16 + $0x1] ss:$0 sm:$0xff] }
 0xeec   : > { %v3928_v8 = vpop.f32.mrb[86].mxu0 }
 0xeed   : > { %v5143_v9 = vpop.f32.mrb[87].mxu0 }
 0xef2   : > { %v4027_v10 = vpop.f32.mrb[88].mxu0 }
 0xef3   : > { %v5154_v11 = vpop.f32.mrb[89].mxu0 }
 0xef4   : > { %v4030_v12 = vpop.f32.mrb[90].mxu0 }
 0xef5   : > { %v5155_v13 = vpop.f32.mrb[91].mxu0  ;;  %v4671_v12 = vld [vmem:[%s6128_s15 + $0x1] ss:$0 sm:$0xff] }
 0xefa   : > { %v3979_v16 = vpop.f32.mrb[76].mxu1 }
 0xefb   : > { %v3985_v17 = vadd.f32 %v3979_v16, %v3937_v15  ;;  %v5148_v18 = vpop.f32.mrb[77].mxu1 }
 0xefc   : > { %v3982_v20 = vpop.f32.mrb[78].mxu1 }
 0xefd   : > { %v5149_v21 = vpop.f32.mrb[79].mxu1  ;;  %v4033_v22 = vadd.f32 %v4027_v10, %v3985_v17 }
 0xf02   : > { %v4075_v51 = vpop.f32.mrb[80].mxu1 }
 0xf03   : > { %v4081_v24 = vadd.f32 %v4075_v51, %v4033_v22  ;;  %v5160_v25 = vpop.f32.mrb[81].mxu1 }
 0xf04   : > { %v4078_v26 = vpop.f32.mrb[82].mxu1 }
 0xf05   : > { %v5161_v27 = vpop.f32.mrb[83].mxu1  ;;  %v4082_v28 = vadd.f32 %v4081_v24, %v5794_v23  ;;  %v5256_v23 = vld [vmem:[%s6124_s11 + $0x20] sm:$0xff]   ;;  %v5314_v26 = vmov 1966171168  }
 0xf06   : > { %5171 = vmatpush3.bf16.msra.mxu1 %v5256_v23  ;;  %v4339_v27 = vunpack.c.l.s4 %v5314_v26 }
 0xf07   : > { %v4087_v29 = vsel %vm585_vm2, %v4082_v28, 0.0  ;;  %5172 = vmatprep.subr.bf16.mxu1 %v5309_v1 }
 0xf08   : > { %4088 = vadd.xlane.f32.xlu0 %v4087_v29 }
 0xf0a   : > { %5173 = vmatpush3.bf16.msra.mxu1 %v5257_v37 }
 0xf0b   : > { %5174 = vmatprep.subr.bf16.mxu1 %v5309_v1 }
 0xf0e   : > { %5175 = vmatpush3.bf16.msra.mxu1 %v5258_v42 }
 0xf0f   : > { %5176 = vmatprep.subr.bf16.mxu1 %v5309_v1  ;;  %v4663_v1 = vld [vmem:[%s6125_s12 + $0x1] ss:$0 sm:$0xff] }
 0xf12   : > { %5177 = vmatpush3.bf16.msra.mxu1 %v5259_v48 }
 0xf95   : > { %v4089_v30 = vpop.xlane.xlu0 %4088 }
 0xf96   : > { %v4090_v31 = vmul.f32 0.03125, %v4089_v30  ;;  %v4340_v30 = vunpack.c.0.s8 %v4339_v27 }
 0xf98   : > { %v4091_v32 = vsub.f32 %v4082_v28, %v4090_v31  ;;  %v4342_v31 = vshrl.u32 %v560_v5, 7 }
 0xf9a   : > { %v4092_v34 = vmul.f32 %v4091_v32, %v4091_v32  ;;  %v4343_v37 = vsub.s32 %v4340_v30, %v4342_v31 }
 0xf9c   : > { %v4093_v35 = vsel %vm585_vm2, %v4092_v34, 0.0 }
 0xf9d   : > { %4094 = vadd.xlane.f32.xlu1 %v4093_v35 }
0x102a   : > { %v4095_v38 = vpop.xlane.xlu1 %4094 }
0x102b   : > { %v4096_v39 = vmul.f32 0.03125, %v4095_v38 }
0x102d   : > { %v4097_v40 = vadd.f32 1e-05, %v4096_v39 }
0x102f   : > { %5296 = vrsqrt.f32 %v4097_v40 }
0x1039   : > { %v5297_v43 = vpop.eup %5296 }
0x103a   : > { %v4099_v44 = vmul.f32 %v5297_v43, %v4091_v32 }
0x103c   : > { %v4106_v45 = vmul.f32 %v4643_v33, %v4099_v44 }
0x103e   : > { %v4113_v46 = vadd.f32 %v4644_v41, %v4106_v45 }
0x1040   : > { %v4119_v47 = vpack.c.bf16 %v4113_v46, %v4113_v46 }
0x1042   : > { %5167 = vmatmul.mubr.msk.bf16.vlgmr.msra.gmra.mrb[92].mxu0 %vm585_vm2, %v4119_v47 }
0x1115   : > { %v4177_v50 = vpop.f32.mrb[92].mxu0 }
0x1116   : > { %v4178_v52 = vadd.f32 %v4650_v49, %v4177_v50  ;;  %v5168_v53 = vpop.f32.mrb[93].mxu0 }
0x1117   : > { %v4180_v54 = vpop.f32.mrb[94].mxu0 }
0x1118   : > { %v4183_v55 = vmax.f32 %v4178_v52, 0.0  ;;  %v5169_v56 = vpop.f32.mrb[95].mxu0 }
0x111a   : > { %v4193_v57 = vpack.c.bf16 %v4183_v55, %v4183_v55 }
0x111c   : > { %5179 = vmatmul.mubr.msk.bf16.vlgmr.msra.gmra.mrb[84].mxu1 %vm2393_vm5, %v4193_v57 }
0x11ef   : > { %v4263_v58 = vpop.f32.mrb[84].mxu1 }
0x11f0   : > { %v4264_v59 = vadd.f32 %v4663_v1, %v4263_v58  ;;  %v5180_v60 = vpop.f32.mrb[85].mxu1 }
0x11f1   : > { %v4266_v61 = vpop.f32.mrb[86].mxu1 }
0x11f2   : > { %v5181_v62 = vpop.f32.mrb[87].mxu1  ;;  %v4269_v63 = vadd.f32 %v4264_v59, %v4113_v46 }
0x11f4   : > { %v4274_v0 = vsel %vm585_vm2, %v4269_v63, 0.0 }
0x11f5   : > { %4275 = vadd.xlane.f32.xlu0 %v4274_v0 }
0x1282   : > { %v4276_v2 = vpop.xlane.xlu0 %4275 }
0x1283   : > { %v4277_v3 = vmul.f32 0.03125, %v4276_v2 }
0x1285   : > { %v4278_v4 = vsub.f32 %v4269_v63, %v4277_v3 }
0x1287   : > { %v4279_v6 = vmul.f32 %v4278_v4, %v4278_v4 }
0x1289   : > { %v4280_v7 = vsel %vm585_vm2, %v4279_v6, 0.0 }
0x128a   : > { %4281 = vadd.xlane.f32.xlu1 %v4280_v7 }
0x1317   : > { %v4282_v8 = vpop.xlane.xlu1 %4281 }
0x1318   : > { %v4283_v9 = vmul.f32 0.03125, %v4282_v8 }
0x131a   : > { %v4284_v10 = vadd.f32 1e-05, %v4283_v9 }
0x131c   : > { %5298 = vrsqrt.f32 %v4284_v10 }
0x1326   : > { %v5299_v11 = vpop.eup %5298 }
0x1327   : > { %v4286_v13 = vmul.f32 %v5299_v11, %v4278_v4 }
0x1329   : > { %v4293_v15 = vmul.f32 %v4671_v12, %v4286_v13 }
0x132b   : > { %v4300_v16 = vadd.f32 %v4672_v14, %v4293_v15 }
0x132d   : > { %v4316_v17 = vrot.slane %v4300_v16, 5  ;;  %v4302_v18 = vrot.slane %v4300_v16, 1  ;;  %v4306_v20 = vrot.slane %v4300_v16, 2  ;;  %v4320_v21 = vrot.slane %v4300_v16, 6 }
0x132e   : > { %v4310_v22 = vrot.slane %v4300_v16, 3  ;;  %v4324_v51 = vrot.slane %v4300_v16, 7  ;;  %v4314_v32 = vrot.slane %v4300_v16, 4 }
0x132f   : > { %4317 = vrot.lane.b32.xlu1 %v4316_v17, %s5311_s26  ;;  %4303 = vrot.lane.b32.xlu0 %v4302_v18, %s5311_s26 }
0x1333   : > { %4307 = vrot.lane.b32.xlu1 %v4306_v20, %s5312_s27  ;;  %4321 = vrot.lane.b32.xlu0 %v4320_v21, %s5312_s27 }
0x1337   : > { %4311 = vrot.lane.b32.xlu1 %v4310_v22, %s5313_s29  ;;  %4325 = vrot.lane.b32.xlu0 %v4324_v51, %s5313_s29 }
0x13a1   : > { %v4318_v24 = vpop.permute.xlu1 %4317  ;;  %v4304_v25 = vpop.permute.xlu0 %4303 }
0x13a2   : > { %v4332_v34 = vsel %vm585_vm2, %v4314_v32, %v4318_v24  ;;  %v4328_v35 = vsel %vm585_vm2, %v4300_v16, %v4304_v25 }
0x13a5   : > { %v4308_v28 = vpop.permute.xlu1 %4307  ;;  %v4322_v29 = vpop.permute.xlu0 %4321 }
0x13a6   : > { %v4329_v36 = vsel %vm2393_vm5, %v4328_v35, %v4308_v28  ;;  %v4333_v19 = vsel %vm2393_vm5, %v4332_v34, %v4322_v29 }
0x13a9   : > { %v4312_v23 = vpop.permute.xlu1 %4311  ;;  %v4326_v38 = vpop.permute.xlu0 %4325 }
0x13aa   : > { %v4331_v39 = vsel %vm4330_vm6, %v4329_v36, %v4312_v23  ;;  %v4334_v40 = vsel %vm4330_vm6, %v4333_v19, %v4326_v38 }
0x13ab   : > { %v4337_v43 = vcombine.low %v4331_v39, %v4334_v40 }
0x13ad   : > { %v4344_v33 = vrot.slane %v4337_v43, %v4343_v37 }
0x13af   : > { %v4351_v44 = vrot.slane %v4344_v33, %v4343_v37 }
0x13b1   : > { %4357 = vst.msk [vmem:[%s557_s19] sm:$0x3] %vm4355_vm7, %v4351_v44 }
0x13b2 PF: > { %s27_s24 = sadd.s32 1, %s5306_s24  }
0x13b3   : > { %p24_p4 = scmp.ge.s32.totalorder %s27_s24, 4  }
0x13b5   :  { %26 = sbr.rel (!%p24_p4) target bundleno = 3 (0x3), region = 133 }

</bundles_post_ra>
